<compile_context>
chip_gen: v5e
topology: v5e:2x2
jax: 0.10.0
libtpu: 0.0.40
codegen_flags: <defaults>
</compile_context>

<pallas_src>
import numpy as np
import jax
import jax.numpy as jnp
from jax.experimental import pallas as pl
from jax.experimental.pallas import tpu as pltpu

# HighwayDCBlock config from SeqClassifier.__init__
K_SZS = (2, 2, 2, 2, 2, 1, 1)
DILS  = (1, 2, 4, 8, 16, 1, 1)
N_LAYERS = len(K_SZS)
MAX_DIL = max(DILS)          # = 16: depth of the causal-history carry


def _round_up(n, m):
    return ((n + m - 1) // m) * m


def _seq_kernel(x_ref, wf_ref, bf_ref, wcur_ref, wpast_ref, bht_ref,
                wc1_ref, bc1_ref, wc2_ref, bc2_ref, o_ref, carry_ref):
    tT = x_ref.shape[1]
    E = wf_ref.shape[1]

    # New sequence (first T-tile of this batch row): clear the causal-history carry.
    @pl.when(pl.program_id(1) == 0)
    def _():
        carry_ref[...] = jnp.zeros_like(carry_ref)

    x = x_ref[0]                                                    # (tT, Cin_pad) bf16

    # front_1x1: Conv1d(input_ch, e_ch, 1) == channel matmul (bf16 MXU, f32 accumulate)
    e = jnp.dot(x, wf_ref[...], preferred_element_type=jnp.float32) + bf_ref[...]

    # HighwayDCBlock: statically unrolled stack of highway dilated causal conv layers.
    for l, (k, d) in enumerate(zip(K_SZS, DILS)):
        # Fused H|T current-tap matmul: (tT, E) x (E, 2E)
        ht = jnp.dot(e.astype(jnp.bfloat16), wcur_ref[l],
                     preferred_element_type=jnp.float32) + bht_ref[l]        # (tT, 2E) f32
        if k == 2:
            # Causal dilated tap e[t-d] via the carried tail of the previous tile.
            prev_tail = carry_ref[l]                                 # (MAX_DIL, E) prev tile's e
            carry_ref[l] = e[tT - MAX_DIL:, :]                       # save tail for next tile
            e_ext = jnp.concatenate([prev_tail, e], axis=0)          # (MAX_DIL + tT, E)
            e_shift = e_ext[MAX_DIL - d: MAX_DIL - d + tT, :]        # e[t - d], zeros before t=0
            ht = ht + jnp.dot(e_shift.astype(jnp.bfloat16), wpast_ref[l],
                              preferred_element_type=jnp.float32)
        h = jnp.maximum(ht[:, :E], 0.0)
        tg = jax.nn.sigmoid(ht[:, E:])
        e = h * tg + e * (1.0 - tg)

    # classifier: Conv1d(E, E, 1) -> ReLU -> Conv1d(E, 1, 1)
    c = jnp.maximum(
        jnp.dot(e.astype(jnp.bfloat16), wc1_ref[...],
                preferred_element_type=jnp.float32) + bc1_ref[...], 0.0)
    # Final E -> 1 projection as a VPU/XLU reduction (avoids a 1-column MXU matmul).
    out = jnp.sum(c * wc2_ref[...], axis=-1, keepdims=True) + bc2_ref[...]   # (tT, 1)
    o_ref[0] = out


def seq_model_forward(x_blc, params, block_t=512):
    """x_blc: (B, T, Cin) float32 channels-last.  Returns (B, T) == PyTorch .squeeze(1)."""
    B, T, Cin = x_blc.shape
    E = params["wf"].shape[1]
    L = N_LAYERS

    # T tile: multiple of 16 (bf16 sublane packing), >= max dilation, <= padded T.
    tT = _round_up(min(max(block_t, MAX_DIL), _round_up(T, 16)), 16)
    T_pad = _round_up(T, tT)
    nT = T_pad // tT
    cin_pad = _round_up(Cin, 128)

    # Zero-pad channels (lane-dense) and trailing time (causal => earlier outputs unaffected).
    x = jnp.pad(x_blc, ((0, 0), (0, T_pad - T), (0, cin_pad - Cin))).astype(jnp.bfloat16)

    # bf16 MXU weights; fuse H- and T-branch weights along the output dim (E -> 2E).
    wf = jnp.pad(params["wf"], ((0, cin_pad - Cin), (0, 0))).astype(jnp.bfloat16)
    w_cur = jnp.concatenate([params["wh"][:, 1], params["wt"][:, 1]], axis=-1).astype(jnp.bfloat16)
    w_past = jnp.concatenate([params["wh"][:, 0], params["wt"][:, 0]], axis=-1).astype(jnp.bfloat16)
    b_ht = jnp.concatenate([params["bh"], params["bt"]], axis=-1)            # (L, 1, 2E) f32
    wc1 = params["wc1"].astype(jnp.bfloat16)
    wc2 = params["wc2"].reshape(1, E)                                        # f32 (VPU reduction)
    bf, bc1, bc2 = params["bf"], params["bc1"], params["bc2"]

    out = pl.pallas_call(
        _seq_kernel,
        out_shape=jax.ShapeDtypeStruct((B, T_pad, 1), jnp.float32),
        grid_spec=pltpu.PrefetchScalarGridSpec(
            num_scalar_prefetch=0,
            grid=(B, nT),
            in_specs=[
                pl.BlockSpec((1, tT, cin_pad), lambda b, j: (b, j, 0)),      # x tile
                pl.BlockSpec((cin_pad, E), lambda b, j: (0, 0)),             # front_1x1 W
                pl.BlockSpec((1, E), lambda b, j: (0, 0)),                   # front_1x1 b
                pl.BlockSpec((L, E, 2 * E), lambda b, j: (0, 0, 0)),         # fused H|T current tap
                pl.BlockSpec((L, E, 2 * E), lambda b, j: (0, 0, 0)),         # fused H|T past tap
                pl.BlockSpec((L, 1, 2 * E), lambda b, j: (0, 0, 0)),         # fused H|T bias
                pl.BlockSpec((E, E), lambda b, j: (0, 0)),                   # classifier conv1 W
                pl.BlockSpec((1, E), lambda b, j: (0, 0)),                   # classifier conv1 b
                pl.BlockSpec((1, E), lambda b, j: (0, 0)),                   # classifier conv2 W
                pl.BlockSpec((1, 1), lambda b, j: (0, 0)),                   # classifier conv2 b
            ],
            out_specs=pl.BlockSpec((1, tT, 1), lambda b, j: (b, j, 0)),
            scratch_shapes=[pltpu.VMEM((L, MAX_DIL, E), jnp.float32)],       # causal carry
        ),
        compiler_params=pltpu.CompilerParams(
            dimension_semantics=("parallel", "arbitrary"),
            vmem_limit_bytes=48 * 1024 * 1024,
        ),
    )(x, wf, bf, w_cur, w_past, b_ht, wc1, bc1, wc2, bc2)
    return out[:, :T, 0]


def init_params(key, cin, e_ch):
    """Deterministic synthetic parameters matching the module's layer shapes."""
    L = N_LAYERS
    ks = jax.random.split(key, 8)

    def w(k, shape, fan_in):
        return (jax.random.normal(k, shape, jnp.float32) / np.sqrt(fan_in)).astype(jnp.float32)

    return dict(
        wf=w(ks[0], (cin, e_ch), cin),                    # front_1x1 weight (Cin, E)
        bf=jnp.full((1, e_ch), 0.01, jnp.float32),        # front_1x1 bias
        wh=w(ks[1], (L, 2, e_ch, e_ch), 2 * e_ch),        # highway "H" conv taps (past, current)
        bh=0.1 * w(ks[2], (L, 1, e_ch), e_ch),
        wt=w(ks[3], (L, 2, e_ch, e_ch), 2 * e_ch),        # highway "T" (gate) conv taps
        bt=0.1 * w(ks[4], (L, 1, e_ch), e_ch),
        wc1=w(ks[5], (e_ch, e_ch), e_ch),                 # classifier conv1
        bc1=jnp.zeros((1, e_ch), jnp.float32),
        wc2=w(ks[6], (e_ch, 1), e_ch),                    # classifier conv2 -> 1 channel
        bc2=jnp.zeros((1, 1), jnp.float32),
    )


def ref_forward(x_blc, p):
    """Pure-JAX reference mirroring the kernel numerics (bf16 MXU operands, f32 accumulate,
    causal shift via zero padding)."""
    B, T, _ = x_blc.shape
    bf16, f32 = jnp.bfloat16, jnp.float32
    e = jnp.einsum("btc,ce->bte", x_blc.astype(bf16), p["wf"].astype(bf16),
                   preferred_element_type=f32) + p["bf"]
    for l, (k, d) in enumerate(zip(K_SZS, DILS)):
        h = jnp.einsum("bte,ef->btf", e.astype(bf16), p["wh"][l, 1].astype(bf16),
                       preferred_element_type=f32) + p["bh"][l]
        t = jnp.einsum("bte,ef->btf", e.astype(bf16), p["wt"][l, 1].astype(bf16),
                       preferred_element_type=f32) + p["bt"][l]
        if k == 2:
            e_shift = jnp.pad(e, ((0, 0), (d, 0), (0, 0)))[:, :T, :]
            h = h + jnp.einsum("bte,ef->btf", e_shift.astype(bf16), p["wh"][l, 0].astype(bf16),
                               preferred_element_type=f32)
            t = t + jnp.einsum("bte,ef->btf", e_shift.astype(bf16), p["wt"][l, 0].astype(bf16),
                               preferred_element_type=f32)
        h = jax.nn.relu(h)
        tg = jax.nn.sigmoid(t)
        e = h * tg + e * (1.0 - tg)
    c = jax.nn.relu(jnp.einsum("bte,ef->btf", e.astype(bf16), p["wc1"].astype(bf16),
                               preferred_element_type=f32) + p["bc1"])
    return jnp.sum(c * p["wc2"].reshape(1, 1, -1), axis=-1) + p["bc2"][0, 0]


if __name__ == "__main__":
    B, T, CIN, E = 2, 64, 16, 32          # small stand-ins for (INPUT_DIM=122, e_ch=256)
    key = jax.random.PRNGKey(0)
    kx, kp = jax.random.split(key)

    # PyTorch layout is NCT (B, Cin, T); kernel layout is (B, T, Cin).
    x_nct = jax.random.normal(kx, (B, CIN, T), jnp.float32)
    x_blc = jnp.transpose(x_nct, (0, 2, 1))

    params = init_params(kp, CIN, E)

    # block_t=32 with T=64 gives 2 T-tiles per sequence, exercising the causal carry.
    out = seq_model_forward(x_blc, params, block_t=32)
    out = jax.block_until_ready(out)
    assert out.shape == (B, T)

    ref = ref_forward(x_blc, params)
    np.testing.assert_allclose(np.asarray(out), np.asarray(ref, dtype=np.float32),
                               rtol=1e-2, atol=1e-2)

    print("KERNEL_OK")
</pallas_src>

<mosaic_0001>
module attributes {stable_mosaic.version = 11 : i64} {
  func.func @_seq_kernel(%arg0: i32, %arg1: i32, %arg2: memref<1x32x128xbf16, #tpu.memory_space<vmem>>, %arg3: memref<128x32xbf16, #tpu.memory_space<vmem>>, %arg4: memref<1x32xf32, #tpu.memory_space<vmem>>, %arg5: memref<7x32x64xbf16, #tpu.memory_space<vmem>>, %arg6: memref<7x32x64xbf16, #tpu.memory_space<vmem>>, %arg7: memref<7x1x64xf32, #tpu.memory_space<vmem>>, %arg8: memref<32x32xbf16, #tpu.memory_space<vmem>>, %arg9: memref<1x32xf32, #tpu.memory_space<vmem>>, %arg10: memref<1x32xf32, #tpu.memory_space<vmem>>, %arg11: memref<1x1xf32, #tpu.memory_space<vmem>>, %arg12: memref<1x32x1xf32, #tpu.memory_space<vmem>>, %arg13: memref<7x16x32xf32, #tpu.memory_space<vmem>>) attributes {dimension_semantics = [#tpu.dimension_semantics<parallel>, #tpu.dimension_semantics<arbitrary>], iteration_bounds = array<i64: 2, 2>, scalar_prefetch = 0 : i64, scratch_operands = 1 : i64, tpu.core_type = #tpu.core_type<tc>, window_params = [{transform_indices = @transform_0, window_bounds = array<i64: 1, 32, 128>}, {pipeline_mode = #tpu.pipeline_mode<synchronous>, transform_indices = @transform_1, window_bounds = array<i64: 128, 32>}, {pipeline_mode = #tpu.pipeline_mode<synchronous>, transform_indices = @transform_2, window_bounds = array<i64: 1, 32>}, {pipeline_mode = #tpu.pipeline_mode<synchronous>, transform_indices = @transform_3, window_bounds = array<i64: 7, 32, 64>}, {pipeline_mode = #tpu.pipeline_mode<synchronous>, transform_indices = @transform_4, window_bounds = array<i64: 7, 32, 64>}, {pipeline_mode = #tpu.pipeline_mode<synchronous>, transform_indices = @transform_5, window_bounds = array<i64: 7, 1, 64>}, {pipeline_mode = #tpu.pipeline_mode<synchronous>, transform_indices = @transform_6, window_bounds = array<i64: 32, 32>}, {pipeline_mode = #tpu.pipeline_mode<synchronous>, transform_indices = @transform_7, window_bounds = array<i64: 1, 32>}, {pipeline_mode = #tpu.pipeline_mode<synchronous>, transform_indices = @transform_8, window_bounds = array<i64: 1, 32>}, {pipeline_mode = #tpu.pipeline_mode<synchronous>, transform_indices = @transform_9, window_bounds = array<i64: 1, 1>}, {transform_indices = @transform_10, window_bounds = array<i64: 1, 32, 1>}]} {
    %c0_i32 = arith.constant 0 : i32
    %0 = arith.cmpi eq, %arg1, %c0_i32 : i32
    %1 = arith.extui %0 : i1 to i32
    %c0_i32_0 = arith.constant 0 : i32
    %2 = arith.cmpi ne, %1, %c0_i32_0 : i32
    scf.if %2 {
      %cst_135 = arith.constant 0.000000e+00 : f32
      %248 = vector.broadcast %cst_135 : f32 to vector<7x16x32xf32>
      %c0_136 = arith.constant 0 : index
      %c0_137 = arith.constant 0 : index
      %c0_138 = arith.constant 0 : index
      %249 = vector.load %arg13[%c0_136, %c0_137, %c0_138] : memref<7x16x32xf32, #tpu.memory_space<vmem>>, vector<7x16x32xf32>
      tpu.vector_store %arg13[%c0_136, %c0_137, %c0_138], %248 {strides = array<i32>} : memref<7x16x32xf32, #tpu.memory_space<vmem>>, vector<7x16x32xf32>,
    } else {
    }
    %c0 = arith.constant 0 : index
    %c0_1 = arith.constant 0 : index
    %c0_2 = arith.constant 0 : index
    %3 = vector.load %arg2[%c0, %c0_1, %c0_2] : memref<1x32x128xbf16, #tpu.memory_space<vmem>>, vector<1x32x128xbf16>
    %4 = vector.shape_cast %3 : vector<1x32x128xbf16> to vector<32x128xbf16>
    %c0_3 = arith.constant 0 : index
    %c0_4 = arith.constant 0 : index
    %5 = vector.load %arg3[%c0_3, %c0_4] : memref<128x32xbf16, #tpu.memory_space<vmem>>, vector<128x32xbf16>
    %cst = arith.constant dense<0.000000e+00> : vector<32x32xf32>
    %6 = tpu.matmul %4, %5, %cst {dimension_numbers = #tpu.dot_dimension_numbers<[1], [0], [0], [1], [0, 0, 1, 1], [], []>} : vector<32x128xbf16>, vector<128x32xbf16>, vector<32x32xf32> -> vector<32x32xf32>
    %c0_5 = arith.constant 0 : index
    %c0_6 = arith.constant 0 : index
    %7 = vector.load %arg4[%c0_5, %c0_6] : memref<1x32xf32, #tpu.memory_space<vmem>>, vector<1x32xf32>
    %8 = vector.broadcast %7 : vector<1x32xf32> to vector<32x32xf32>
    %9 = arith.addf %6, %8 : vector<32x32xf32>
    %10 = arith.truncf %9 : vector<32x32xf32> to vector<32x32xbf16>
    %c0_7 = arith.constant 0 : index
    %c0_8 = arith.constant 0 : index
    %c0_9 = arith.constant 0 : index
    %11 = vector.load %arg5[%c0_7, %c0_8, %c0_9] : memref<7x32x64xbf16, #tpu.memory_space<vmem>>, vector<1x32x64xbf16>
    %12 = vector.shape_cast %11 : vector<1x32x64xbf16> to vector<32x64xbf16>
    %cst_10 = arith.constant dense<0.000000e+00> : vector<32x64xf32>
    %13 = tpu.matmul %10, %12, %cst_10 {dimension_numbers = #tpu.dot_dimension_numbers<[1], [0], [0], [1], [0, 0, 1, 1], [], []>} : vector<32x32xbf16>, vector<32x64xbf16>, vector<32x64xf32> -> vector<32x64xf32>
    %c0_11 = arith.constant 0 : index
    %c0_12 = arith.constant 0 : index
    %c0_13 = arith.constant 0 : index
    %14 = vector.load %arg7[%c0_11, %c0_12, %c0_13] : memref<7x1x64xf32, #tpu.memory_space<vmem>>, vector<1x1x64xf32>
    %15 = vector.shape_cast %14 : vector<1x1x64xf32> to vector<1x64xf32>
    %16 = vector.broadcast %15 : vector<1x64xf32> to vector<32x64xf32>
    %17 = arith.addf %13, %16 : vector<32x64xf32>
    %c0_14 = arith.constant 0 : index
    %c0_15 = arith.constant 0 : index
    %c0_16 = arith.constant 0 : index
    %18 = vector.load %arg13[%c0_14, %c0_15, %c0_16] : memref<7x16x32xf32, #tpu.memory_space<vmem>>, vector<1x16x32xf32>
    %19 = vector.shape_cast %18 : vector<1x16x32xf32> to vector<16x32xf32>
    %20 = vector.extract_strided_slice %9 {offsets = [16, 0], sizes = [16, 32], strides = [1, 1]} : vector<32x32xf32> to vector<16x32xf32>
    %c0_17 = arith.constant 0 : index
    %c0_18 = arith.constant 0 : index
    %c0_19 = arith.constant 0 : index
    %21 = vector.load %arg13[%c0_17, %c0_18, %c0_19] : memref<7x16x32xf32, #tpu.memory_space<vmem>>, vector<1x16x32xf32>
    %22 = vector.shape_cast %21 : vector<1x16x32xf32> to vector<16x32xf32>
    %23 = vector.shape_cast %20 : vector<16x32xf32> to vector<1x16x32xf32>
    tpu.vector_store %arg13[%c0_17, %c0_18, %c0_19], %23 {strides = array<i32>} : memref<7x16x32xf32, #tpu.memory_space<vmem>>, vector<1x16x32xf32>,
    %24 = tpu.concatenate %19, %9 in 0 : vector<16x32xf32>, vector<32x32xf32> -> vector<48x32xf32>
    %25 = vector.extract_strided_slice %24 {offsets = [15, 0], sizes = [32, 32], strides = [1, 1]} : vector<48x32xf32> to vector<32x32xf32>
    %26 = arith.truncf %25 : vector<32x32xf32> to vector<32x32xbf16>
    %c0_20 = arith.constant 0 : index
    %c0_21 = arith.constant 0 : index
    %c0_22 = arith.constant 0 : index
    %27 = vector.load %arg6[%c0_20, %c0_21, %c0_22] : memref<7x32x64xbf16, #tpu.memory_space<vmem>>, vector<1x32x64xbf16>
    %28 = vector.shape_cast %27 : vector<1x32x64xbf16> to vector<32x64xbf16>
    %cst_23 = arith.constant dense<0.000000e+00> : vector<32x64xf32>
    %29 = tpu.matmul %26, %28, %cst_23 {dimension_numbers = #tpu.dot_dimension_numbers<[1], [0], [0], [1], [0, 0, 1, 1], [], []>} : vector<32x32xbf16>, vector<32x64xbf16>, vector<32x64xf32> -> vector<32x64xf32>
    %30 = arith.addf %17, %29 : vector<32x64xf32>
    %31 = vector.extract_strided_slice %30 {offsets = [0, 0], sizes = [32, 32], strides = [1, 1]} : vector<32x64xf32> to vector<32x32xf32>
    %cst_24 = arith.constant 0.000000e+00 : f32
    %32 = vector.broadcast %cst_24 : f32 to vector<32x32xf32>
    %33 = arith.maximumf %31, %32 : vector<32x32xf32>
    %34 = vector.extract_strided_slice %30 {offsets = [0, 32], sizes = [32, 32], strides = [1, 1]} : vector<32x64xf32> to vector<32x32xf32>
    %35 = arith.negf %34 : vector<32x32xf32>
    %36 = math.exp %35 : vector<32x32xf32>
    %cst_25 = arith.constant 1.000000e+00 : f32
    %37 = vector.broadcast %cst_25 : f32 to vector<32x32xf32>
    %38 = arith.addf %37, %36 : vector<32x32xf32>
    %39 = arith.divf %37, %38 : vector<32x32xf32>
    %40 = arith.mulf %33, %39 : vector<32x32xf32>
    %cst_26 = arith.constant 1.000000e+00 : f32
    %41 = vector.broadcast %cst_26 : f32 to vector<32x32xf32>
    %42 = arith.subf %41, %39 : vector<32x32xf32>
    %43 = arith.mulf %9, %42 : vector<32x32xf32>
    %44 = arith.addf %40, %43 : vector<32x32xf32>
    %45 = arith.truncf %44 : vector<32x32xf32> to vector<32x32xbf16>
    %c1 = arith.constant 1 : index
    %c0_27 = arith.constant 0 : index
    %c0_28 = arith.constant 0 : index
    %46 = vector.load %arg5[%c1, %c0_27, %c0_28] : memref<7x32x64xbf16, #tpu.memory_space<vmem>>, vector<1x32x64xbf16>
    %47 = vector.shape_cast %46 : vector<1x32x64xbf16> to vector<32x64xbf16>
    %cst_29 = arith.constant dense<0.000000e+00> : vector<32x64xf32>
    %48 = tpu.matmul %45, %47, %cst_29 {dimension_numbers = #tpu.dot_dimension_numbers<[1], [0], [0], [1], [0, 0, 1, 1], [], []>} : vector<32x32xbf16>, vector<32x64xbf16>, vector<32x64xf32> -> vector<32x64xf32>
    %c1_30 = arith.constant 1 : index
    %c0_31 = arith.constant 0 : index
    %c0_32 = arith.constant 0 : index
    %49 = vector.load %arg7[%c1_30, %c0_31, %c0_32] : memref<7x1x64xf32, #tpu.memory_space<vmem>>, vector<1x1x64xf32>
    %50 = vector.shape_cast %49 : vector<1x1x64xf32> to vector<1x64xf32>
    %51 = vector.broadcast %50 : vector<1x64xf32> to vector<32x64xf32>
    %52 = arith.addf %48, %51 : vector<32x64xf32>
    %c1_33 = arith.constant 1 : index
    %c0_34 = arith.constant 0 : index
    %c0_35 = arith.constant 0 : index
    %53 = vector.load %arg13[%c1_33, %c0_34, %c0_35] : memref<7x16x32xf32, #tpu.memory_space<vmem>>, vector<1x16x32xf32>
    %54 = vector.shape_cast %53 : vector<1x16x32xf32> to vector<16x32xf32>
    %55 = vector.extract_strided_slice %44 {offsets = [16, 0], sizes = [16, 32], strides = [1, 1]} : vector<32x32xf32> to vector<16x32xf32>
    %c1_36 = arith.constant 1 : index
    %c0_37 = arith.constant 0 : index
    %c0_38 = arith.constant 0 : index
    %56 = vector.load %arg13[%c1_36, %c0_37, %c0_38] : memref<7x16x32xf32, #tpu.memory_space<vmem>>, vector<1x16x32xf32>
    %57 = vector.shape_cast %56 : vector<1x16x32xf32> to vector<16x32xf32>
    %58 = vector.shape_cast %55 : vector<16x32xf32> to vector<1x16x32xf32>
    tpu.vector_store %arg13[%c1_36, %c0_37, %c0_38], %58 {strides = array<i32>} : memref<7x16x32xf32, #tpu.memory_space<vmem>>, vector<1x16x32xf32>,
    %59 = tpu.concatenate %54, %44 in 0 : vector<16x32xf32>, vector<32x32xf32> -> vector<48x32xf32>
    %60 = vector.extract_strided_slice %59 {offsets = [14, 0], sizes = [32, 32], strides = [1, 1]} : vector<48x32xf32> to vector<32x32xf32>
    %61 = arith.truncf %60 : vector<32x32xf32> to vector<32x32xbf16>
    %c1_39 = arith.constant 1 : index
    %c0_40 = arith.constant 0 : index
    %c0_41 = arith.constant 0 : index
    %62 = vector.load %arg6[%c1_39, %c0_40, %c0_41] : memref<7x32x64xbf16, #tpu.memory_space<vmem>>, vector<1x32x64xbf16>
    %63 = vector.shape_cast %62 : vector<1x32x64xbf16> to vector<32x64xbf16>
    %cst_42 = arith.constant dense<0.000000e+00> : vector<32x64xf32>
    %64 = tpu.matmul %61, %63, %cst_42 {dimension_numbers = #tpu.dot_dimension_numbers<[1], [0], [0], [1], [0, 0, 1, 1], [], []>} : vector<32x32xbf16>, vector<32x64xbf16>, vector<32x64xf32> -> vector<32x64xf32>
    %65 = arith.addf %52, %64 : vector<32x64xf32>
    %66 = vector.extract_strided_slice %65 {offsets = [0, 0], sizes = [32, 32], strides = [1, 1]} : vector<32x64xf32> to vector<32x32xf32>
    %cst_43 = arith.constant 0.000000e+00 : f32
    %67 = vector.broadcast %cst_43 : f32 to vector<32x32xf32>
    %68 = arith.maximumf %66, %67 : vector<32x32xf32>
    %69 = vector.extract_strided_slice %65 {offsets = [0, 32], sizes = [32, 32], strides = [1, 1]} : vector<32x64xf32> to vector<32x32xf32>
    %70 = arith.negf %69 : vector<32x32xf32>
    %71 = math.exp %70 : vector<32x32xf32>
    %cst_44 = arith.constant 1.000000e+00 : f32
    %72 = vector.broadcast %cst_44 : f32 to vector<32x32xf32>
    %73 = arith.addf %72, %71 : vector<32x32xf32>
    %74 = arith.divf %72, %73 : vector<32x32xf32>
    %75 = arith.mulf %68, %74 : vector<32x32xf32>
    %cst_45 = arith.constant 1.000000e+00 : f32
    %76 = vector.broadcast %cst_45 : f32 to vector<32x32xf32>
    %77 = arith.subf %76, %74 : vector<32x32xf32>
    %78 = arith.mulf %44, %77 : vector<32x32xf32>
    %79 = arith.addf %75, %78 : vector<32x32xf32>
    %80 = arith.truncf %79 : vector<32x32xf32> to vector<32x32xbf16>
    %c2 = arith.constant 2 : index
    %c0_46 = arith.constant 0 : index
    %c0_47 = arith.constant 0 : index
    %81 = vector.load %arg5[%c2, %c0_46, %c0_47] : memref<7x32x64xbf16, #tpu.memory_space<vmem>>, vector<1x32x64xbf16>
    %82 = vector.shape_cast %81 : vector<1x32x64xbf16> to vector<32x64xbf16>
    %cst_48 = arith.constant dense<0.000000e+00> : vector<32x64xf32>
    %83 = tpu.matmul %80, %82, %cst_48 {dimension_numbers = #tpu.dot_dimension_numbers<[1], [0], [0], [1], [0, 0, 1, 1], [], []>} : vector<32x32xbf16>, vector<32x64xbf16>, vector<32x64xf32> -> vector<32x64xf32>
    %c2_49 = arith.constant 2 : index
    %c0_50 = arith.constant 0 : index
    %c0_51 = arith.constant 0 : index
    %84 = vector.load %arg7[%c2_49, %c0_50, %c0_51] : memref<7x1x64xf32, #tpu.memory_space<vmem>>, vector<1x1x64xf32>
    %85 = vector.shape_cast %84 : vector<1x1x64xf32> to vector<1x64xf32>
    %86 = vector.broadcast %85 : vector<1x64xf32> to vector<32x64xf32>
    %87 = arith.addf %83, %86 : vector<32x64xf32>
    %c2_52 = arith.constant 2 : index
    %c0_53 = arith.constant 0 : index
    %c0_54 = arith.constant 0 : index
    %88 = vector.load %arg13[%c2_52, %c0_53, %c0_54] : memref<7x16x32xf32, #tpu.memory_space<vmem>>, vector<1x16x32xf32>
    %89 = vector.shape_cast %88 : vector<1x16x32xf32> to vector<16x32xf32>
    %90 = vector.extract_strided_slice %79 {offsets = [16, 0], sizes = [16, 32], strides = [1, 1]} : vector<32x32xf32> to vector<16x32xf32>
    %c2_55 = arith.constant 2 : index
    %c0_56 = arith.constant 0 : index
    %c0_57 = arith.constant 0 : index
    %91 = vector.load %arg13[%c2_55, %c0_56, %c0_57] : memref<7x16x32xf32, #tpu.memory_space<vmem>>, vector<1x16x32xf32>
    %92 = vector.shape_cast %91 : vector<1x16x32xf32> to vector<16x32xf32>
    %93 = vector.shape_cast %90 : vector<16x32xf32> to vector<1x16x32xf32>
    tpu.vector_store %arg13[%c2_55, %c0_56, %c0_57], %93 {strides = array<i32>} : memref<7x16x32xf32, #tpu.memory_space<vmem>>, vector<1x16x32xf32>,
    %94 = tpu.concatenate %89, %79 in 0 : vector<16x32xf32>, vector<32x32xf32> -> vector<48x32xf32>
    %95 = vector.extract_strided_slice %94 {offsets = [12, 0], sizes = [32, 32], strides = [1, 1]} : vector<48x32xf32> to vector<32x32xf32>
    %96 = arith.truncf %95 : vector<32x32xf32> to vector<32x32xbf16>
    %c2_58 = arith.constant 2 : index
    %c0_59 = arith.constant 0 : index
    %c0_60 = arith.constant 0 : index
    %97 = vector.load %arg6[%c2_58, %c0_59, %c0_60] : memref<7x32x64xbf16, #tpu.memory_space<vmem>>, vector<1x32x64xbf16>
    %98 = vector.shape_cast %97 : vector<1x32x64xbf16> to vector<32x64xbf16>
    %cst_61 = arith.constant dense<0.000000e+00> : vector<32x64xf32>
    %99 = tpu.matmul %96, %98, %cst_61 {dimension_numbers = #tpu.dot_dimension_numbers<[1], [0], [0], [1], [0, 0, 1, 1], [], []>} : vector<32x32xbf16>, vector<32x64xbf16>, vector<32x64xf32> -> vector<32x64xf32>
    %100 = arith.addf %87, %99 : vector<32x64xf32>
    %101 = vector.extract_strided_slice %100 {offsets = [0, 0], sizes = [32, 32], strides = [1, 1]} : vector<32x64xf32> to vector<32x32xf32>
    %cst_62 = arith.constant 0.000000e+00 : f32
    %102 = vector.broadcast %cst_62 : f32 to vector<32x32xf32>
    %103 = arith.maximumf %101, %102 : vector<32x32xf32>
    %104 = vector.extract_strided_slice %100 {offsets = [0, 32], sizes = [32, 32], strides = [1, 1]} : vector<32x64xf32> to vector<32x32xf32>
    %105 = arith.negf %104 : vector<32x32xf32>
    %106 = math.exp %105 : vector<32x32xf32>
    %cst_63 = arith.constant 1.000000e+00 : f32
    %107 = vector.broadcast %cst_63 : f32 to vector<32x32xf32>
    %108 = arith.addf %107, %106 : vector<32x32xf32>
    %109 = arith.divf %107, %108 : vector<32x32xf32>
    %110 = arith.mulf %103, %109 : vector<32x32xf32>
    %cst_64 = arith.constant 1.000000e+00 : f32
    %111 = vector.broadcast %cst_64 : f32 to vector<32x32xf32>
    %112 = arith.subf %111, %109 : vector<32x32xf32>
    %113 = arith.mulf %79, %112 : vector<32x32xf32>
    %114 = arith.addf %110, %113 : vector<32x32xf32>
    %115 = arith.truncf %114 : vector<32x32xf32> to vector<32x32xbf16>
    %c3 = arith.constant 3 : index
    %c0_65 = arith.constant 0 : index
    %c0_66 = arith.constant 0 : index
    %116 = vector.load %arg5[%c3, %c0_65, %c0_66] : memref<7x32x64xbf16, #tpu.memory_space<vmem>>, vector<1x32x64xbf16>
    %117 = vector.shape_cast %116 : vector<1x32x64xbf16> to vector<32x64xbf16>
    %cst_67 = arith.constant dense<0.000000e+00> : vector<32x64xf32>
    %118 = tpu.matmul %115, %117, %cst_67 {dimension_numbers = #tpu.dot_dimension_numbers<[1], [0], [0], [1], [0, 0, 1, 1], [], []>} : vector<32x32xbf16>, vector<32x64xbf16>, vector<32x64xf32> -> vector<32x64xf32>
    %c3_68 = arith.constant 3 : index
    %c0_69 = arith.constant 0 : index
    %c0_70 = arith.constant 0 : index
    %119 = vector.load %arg7[%c3_68, %c0_69, %c0_70] : memref<7x1x64xf32, #tpu.memory_space<vmem>>, vector<1x1x64xf32>
    %120 = vector.shape_cast %119 : vector<1x1x64xf32> to vector<1x64xf32>
    %121 = vector.broadcast %120 : vector<1x64xf32> to vector<32x64xf32>
    %122 = arith.addf %118, %121 : vector<32x64xf32>
    %c3_71 = arith.constant 3 : index
    %c0_72 = arith.constant 0 : index
    %c0_73 = arith.constant 0 : index
    %123 = vector.load %arg13[%c3_71, %c0_72, %c0_73] : memref<7x16x32xf32, #tpu.memory_space<vmem>>, vector<1x16x32xf32>
    %124 = vector.shape_cast %123 : vector<1x16x32xf32> to vector<16x32xf32>
    %125 = vector.extract_strided_slice %114 {offsets = [16, 0], sizes = [16, 32], strides = [1, 1]} : vector<32x32xf32> to vector<16x32xf32>
    %c3_74 = arith.constant 3 : index
    %c0_75 = arith.constant 0 : index
    %c0_76 = arith.constant 0 : index
    %126 = vector.load %arg13[%c3_74, %c0_75, %c0_76] : memref<7x16x32xf32, #tpu.memory_space<vmem>>, vector<1x16x32xf32>
    %127 = vector.shape_cast %126 : vector<1x16x32xf32> to vector<16x32xf32>
    %128 = vector.shape_cast %125 : vector<16x32xf32> to vector<1x16x32xf32>
    tpu.vector_store %arg13[%c3_74, %c0_75, %c0_76], %128 {strides = array<i32>} : memref<7x16x32xf32, #tpu.memory_space<vmem>>, vector<1x16x32xf32>,
    %129 = tpu.concatenate %124, %114 in 0 : vector<16x32xf32>, vector<32x32xf32> -> vector<48x32xf32>
    %130 = vector.extract_strided_slice %129 {offsets = [8, 0], sizes = [32, 32], strides = [1, 1]} : vector<48x32xf32> to vector<32x32xf32>
    %131 = arith.truncf %130 : vector<32x32xf32> to vector<32x32xbf16>
    %c3_77 = arith.constant 3 : index
    %c0_78 = arith.constant 0 : index
    %c0_79 = arith.constant 0 : index
    %132 = vector.load %arg6[%c3_77, %c0_78, %c0_79] : memref<7x32x64xbf16, #tpu.memory_space<vmem>>, vector<1x32x64xbf16>
    %133 = vector.shape_cast %132 : vector<1x32x64xbf16> to vector<32x64xbf16>
    %cst_80 = arith.constant dense<0.000000e+00> : vector<32x64xf32>
    %134 = tpu.matmul %131, %133, %cst_80 {dimension_numbers = #tpu.dot_dimension_numbers<[1], [0], [0], [1], [0, 0, 1, 1], [], []>} : vector<32x32xbf16>, vector<32x64xbf16>, vector<32x64xf32> -> vector<32x64xf32>
    %135 = arith.addf %122, %134 : vector<32x64xf32>
    %136 = vector.extract_strided_slice %135 {offsets = [0, 0], sizes = [32, 32], strides = [1, 1]} : vector<32x64xf32> to vector<32x32xf32>
    %cst_81 = arith.constant 0.000000e+00 : f32
    %137 = vector.broadcast %cst_81 : f32 to vector<32x32xf32>
    %138 = arith.maximumf %136, %137 : vector<32x32xf32>
    %139 = vector.extract_strided_slice %135 {offsets = [0, 32], sizes = [32, 32], strides = [1, 1]} : vector<32x64xf32> to vector<32x32xf32>
    %140 = arith.negf %139 : vector<32x32xf32>
    %141 = math.exp %140 : vector<32x32xf32>
    %cst_82 = arith.constant 1.000000e+00 : f32
    %142 = vector.broadcast %cst_82 : f32 to vector<32x32xf32>
    %143 = arith.addf %142, %141 : vector<32x32xf32>
    %144 = arith.divf %142, %143 : vector<32x32xf32>
    %145 = arith.mulf %138, %144 : vector<32x32xf32>
    %cst_83 = arith.constant 1.000000e+00 : f32
    %146 = vector.broadcast %cst_83 : f32 to vector<32x32xf32>
    %147 = arith.subf %146, %144 : vector<32x32xf32>
    %148 = arith.mulf %114, %147 : vector<32x32xf32>
    %149 = arith.addf %145, %148 : vector<32x32xf32>
    %150 = arith.truncf %149 : vector<32x32xf32> to vector<32x32xbf16>
    %c4 = arith.constant 4 : index
    %c0_84 = arith.constant 0 : index
    %c0_85 = arith.constant 0 : index
    %151 = vector.load %arg5[%c4, %c0_84, %c0_85] : memref<7x32x64xbf16, #tpu.memory_space<vmem>>, vector<1x32x64xbf16>
    %152 = vector.shape_cast %151 : vector<1x32x64xbf16> to vector<32x64xbf16>
    %cst_86 = arith.constant dense<0.000000e+00> : vector<32x64xf32>
    %153 = tpu.matmul %150, %152, %cst_86 {dimension_numbers = #tpu.dot_dimension_numbers<[1], [0], [0], [1], [0, 0, 1, 1], [], []>} : vector<32x32xbf16>, vector<32x64xbf16>, vector<32x64xf32> -> vector<32x64xf32>
    %c4_87 = arith.constant 4 : index
    %c0_88 = arith.constant 0 : index
    %c0_89 = arith.constant 0 : index
    %154 = vector.load %arg7[%c4_87, %c0_88, %c0_89] : memref<7x1x64xf32, #tpu.memory_space<vmem>>, vector<1x1x64xf32>
    %155 = vector.shape_cast %154 : vector<1x1x64xf32> to vector<1x64xf32>
    %156 = vector.broadcast %155 : vector<1x64xf32> to vector<32x64xf32>
    %157 = arith.addf %153, %156 : vector<32x64xf32>
    %c4_90 = arith.constant 4 : index
    %c0_91 = arith.constant 0 : index
    %c0_92 = arith.constant 0 : index
    %158 = vector.load %arg13[%c4_90, %c0_91, %c0_92] : memref<7x16x32xf32, #tpu.memory_space<vmem>>, vector<1x16x32xf32>
    %159 = vector.shape_cast %158 : vector<1x16x32xf32> to vector<16x32xf32>
    %160 = vector.extract_strided_slice %149 {offsets = [16, 0], sizes = [16, 32], strides = [1, 1]} : vector<32x32xf32> to vector<16x32xf32>
    %c4_93 = arith.constant 4 : index
    %c0_94 = arith.constant 0 : index
    %c0_95 = arith.constant 0 : index
    %161 = vector.load %arg13[%c4_93, %c0_94, %c0_95] : memref<7x16x32xf32, #tpu.memory_space<vmem>>, vector<1x16x32xf32>
    %162 = vector.shape_cast %161 : vector<1x16x32xf32> to vector<16x32xf32>
    %163 = vector.shape_cast %160 : vector<16x32xf32> to vector<1x16x32xf32>
    tpu.vector_store %arg13[%c4_93, %c0_94, %c0_95], %163 {strides = array<i32>} : memref<7x16x32xf32, #tpu.memory_space<vmem>>, vector<1x16x32xf32>,
    %164 = tpu.concatenate %159, %149 in 0 : vector<16x32xf32>, vector<32x32xf32> -> vector<48x32xf32>
    %165 = vector.extract_strided_slice %164 {offsets = [0, 0], sizes = [32, 32], strides = [1, 1]} : vector<48x32xf32> to vector<32x32xf32>
    %166 = arith.truncf %165 : vector<32x32xf32> to vector<32x32xbf16>
    %c4_96 = arith.constant 4 : index
    %c0_97 = arith.constant 0 : index
    %c0_98 = arith.constant 0 : index
    %167 = vector.load %arg6[%c4_96, %c0_97, %c0_98] : memref<7x32x64xbf16, #tpu.memory_space<vmem>>, vector<1x32x64xbf16>
    %168 = vector.shape_cast %167 : vector<1x32x64xbf16> to vector<32x64xbf16>
    %cst_99 = arith.constant dense<0.000000e+00> : vector<32x64xf32>
    %169 = tpu.matmul %166, %168, %cst_99 {dimension_numbers = #tpu.dot_dimension_numbers<[1], [0], [0], [1], [0, 0, 1, 1], [], []>} : vector<32x32xbf16>, vector<32x64xbf16>, vector<32x64xf32> -> vector<32x64xf32>
    %170 = arith.addf %157, %169 : vector<32x64xf32>
    %171 = vector.extract_strided_slice %170 {offsets = [0, 0], sizes = [32, 32], strides = [1, 1]} : vector<32x64xf32> to vector<32x32xf32>
    %cst_100 = arith.constant 0.000000e+00 : f32
    %172 = vector.broadcast %cst_100 : f32 to vector<32x32xf32>
    %173 = arith.maximumf %171, %172 : vector<32x32xf32>
    %174 = vector.extract_strided_slice %170 {offsets = [0, 32], sizes = [32, 32], strides = [1, 1]} : vector<32x64xf32> to vector<32x32xf32>
    %175 = arith.negf %174 : vector<32x32xf32>
    %176 = math.exp %175 : vector<32x32xf32>
    %cst_101 = arith.constant 1.000000e+00 : f32
    %177 = vector.broadcast %cst_101 : f32 to vector<32x32xf32>
    %178 = arith.addf %177, %176 : vector<32x32xf32>
    %179 = arith.divf %177, %178 : vector<32x32xf32>
    %180 = arith.mulf %173, %179 : vector<32x32xf32>
    %cst_102 = arith.constant 1.000000e+00 : f32
    %181 = vector.broadcast %cst_102 : f32 to vector<32x32xf32>
    %182 = arith.subf %181, %179 : vector<32x32xf32>
    %183 = arith.mulf %149, %182 : vector<32x32xf32>
    %184 = arith.addf %180, %183 : vector<32x32xf32>
    %185 = arith.truncf %184 : vector<32x32xf32> to vector<32x32xbf16>
    %c5 = arith.constant 5 : index
    %c0_103 = arith.constant 0 : index
    %c0_104 = arith.constant 0 : index
    %186 = vector.load %arg5[%c5, %c0_103, %c0_104] : memref<7x32x64xbf16, #tpu.memory_space<vmem>>, vector<1x32x64xbf16>
    %187 = vector.shape_cast %186 : vector<1x32x64xbf16> to vector<32x64xbf16>
    %cst_105 = arith.constant dense<0.000000e+00> : vector<32x64xf32>
    %188 = tpu.matmul %185, %187, %cst_105 {dimension_numbers = #tpu.dot_dimension_numbers<[1], [0], [0], [1], [0, 0, 1, 1], [], []>} : vector<32x32xbf16>, vector<32x64xbf16>, vector<32x64xf32> -> vector<32x64xf32>
    %c5_106 = arith.constant 5 : index
    %c0_107 = arith.constant 0 : index
    %c0_108 = arith.constant 0 : index
    %189 = vector.load %arg7[%c5_106, %c0_107, %c0_108] : memref<7x1x64xf32, #tpu.memory_space<vmem>>, vector<1x1x64xf32>
    %190 = vector.shape_cast %189 : vector<1x1x64xf32> to vector<1x64xf32>
    %191 = vector.broadcast %190 : vector<1x64xf32> to vector<32x64xf32>
    %192 = arith.addf %188, %191 : vector<32x64xf32>
    %193 = vector.extract_strided_slice %192 {offsets = [0, 0], sizes = [32, 32], strides = [1, 1]} : vector<32x64xf32> to vector<32x32xf32>
    %cst_109 = arith.constant 0.000000e+00 : f32
    %194 = vector.broadcast %cst_109 : f32 to vector<32x32xf32>
    %195 = arith.maximumf %193, %194 : vector<32x32xf32>
    %196 = vector.extract_strided_slice %192 {offsets = [0, 32], sizes = [32, 32], strides = [1, 1]} : vector<32x64xf32> to vector<32x32xf32>
    %197 = arith.negf %196 : vector<32x32xf32>
    %198 = math.exp %197 : vector<32x32xf32>
    %cst_110 = arith.constant 1.000000e+00 : f32
    %199 = vector.broadcast %cst_110 : f32 to vector<32x32xf32>
    %200 = arith.addf %199, %198 : vector<32x32xf32>
    %201 = arith.divf %199, %200 : vector<32x32xf32>
    %202 = arith.mulf %195, %201 : vector<32x32xf32>
    %cst_111 = arith.constant 1.000000e+00 : f32
    %203 = vector.broadcast %cst_111 : f32 to vector<32x32xf32>
    %204 = arith.subf %203, %201 : vector<32x32xf32>
    %205 = arith.mulf %184, %204 : vector<32x32xf32>
    %206 = arith.addf %202, %205 : vector<32x32xf32>
    %207 = arith.truncf %206 : vector<32x32xf32> to vector<32x32xbf16>
    %c6 = arith.constant 6 : index
    %c0_112 = arith.constant 0 : index
    %c0_113 = arith.constant 0 : index
    %208 = vector.load %arg5[%c6, %c0_112, %c0_113] : memref<7x32x64xbf16, #tpu.memory_space<vmem>>, vector<1x32x64xbf16>
    %209 = vector.shape_cast %208 : vector<1x32x64xbf16> to vector<32x64xbf16>
    %cst_114 = arith.constant dense<0.000000e+00> : vector<32x64xf32>
    %210 = tpu.matmul %207, %209, %cst_114 {dimension_numbers = #tpu.dot_dimension_numbers<[1], [0], [0], [1], [0, 0, 1, 1], [], []>} : vector<32x32xbf16>, vector<32x64xbf16>, vector<32x64xf32> -> vector<32x64xf32>
    %c6_115 = arith.constant 6 : index
    %c0_116 = arith.constant 0 : index
    %c0_117 = arith.constant 0 : index
    %211 = vector.load %arg7[%c6_115, %c0_116, %c0_117] : memref<7x1x64xf32, #tpu.memory_space<vmem>>, vector<1x1x64xf32>
    %212 = vector.shape_cast %211 : vector<1x1x64xf32> to vector<1x64xf32>
    %213 = vector.broadcast %212 : vector<1x64xf32> to vector<32x64xf32>
    %214 = arith.addf %210, %213 : vector<32x64xf32>
    %215 = vector.extract_strided_slice %214 {offsets = [0, 0], sizes = [32, 32], strides = [1, 1]} : vector<32x64xf32> to vector<32x32xf32>
    %cst_118 = arith.constant 0.000000e+00 : f32
    %216 = vector.broadcast %cst_118 : f32 to vector<32x32xf32>
    %217 = arith.maximumf %215, %216 : vector<32x32xf32>
    %218 = vector.extract_strided_slice %214 {offsets = [0, 32], sizes = [32, 32], strides = [1, 1]} : vector<32x64xf32> to vector<32x32xf32>
    %219 = arith.negf %218 : vector<32x32xf32>
    %220 = math.exp %219 : vector<32x32xf32>
    %cst_119 = arith.constant 1.000000e+00 : f32
    %221 = vector.broadcast %cst_119 : f32 to vector<32x32xf32>
    %222 = arith.addf %221, %220 : vector<32x32xf32>
    %223 = arith.divf %221, %222 : vector<32x32xf32>
    %224 = arith.mulf %217, %223 : vector<32x32xf32>
    %cst_120 = arith.constant 1.000000e+00 : f32
    %225 = vector.broadcast %cst_120 : f32 to vector<32x32xf32>
    %226 = arith.subf %225, %223 : vector<32x32xf32>
    %227 = arith.mulf %206, %226 : vector<32x32xf32>
    %228 = arith.addf %224, %227 : vector<32x32xf32>
    %229 = arith.truncf %228 : vector<32x32xf32> to vector<32x32xbf16>
    %c0_121 = arith.constant 0 : index
    %c0_122 = arith.constant 0 : index
    %230 = vector.load %arg8[%c0_121, %c0_122] : memref<32x32xbf16, #tpu.memory_space<vmem>>, vector<32x32xbf16>
    %cst_123 = arith.constant dense<0.000000e+00> : vector<32x32xf32>
    %231 = tpu.matmul %229, %230, %cst_123 {dimension_numbers = #tpu.dot_dimension_numbers<[1], [0], [0], [1], [0, 0, 1, 1], [], []>} : vector<32x32xbf16>, vector<32x32xbf16>, vector<32x32xf32> -> vector<32x32xf32>
    %c0_124 = arith.constant 0 : index
    %c0_125 = arith.constant 0 : index
    %232 = vector.load %arg9[%c0_124, %c0_125] : memref<1x32xf32, #tpu.memory_space<vmem>>, vector<1x32xf32>
    %233 = vector.broadcast %232 : vector<1x32xf32> to vector<32x32xf32>
    %234 = arith.addf %231, %233 : vector<32x32xf32>
    %cst_126 = arith.constant 0.000000e+00 : f32
    %235 = vector.broadcast %cst_126 : f32 to vector<32x32xf32>
    %236 = arith.maximumf %234, %235 : vector<32x32xf32>
    %c0_127 = arith.constant 0 : index
    %c0_128 = arith.constant 0 : index
    %237 = vector.load %arg10[%c0_127, %c0_128] : memref<1x32xf32, #tpu.memory_space<vmem>>, vector<1x32xf32>
    %238 = vector.broadcast %237 : vector<1x32xf32> to vector<32x32xf32>
    %239 = arith.mulf %236, %238 : vector<32x32xf32>
    %cst_129 = arith.constant dense<0.000000e+00> : vector<32xf32>
    %240 = vector.multi_reduction <add>, %239, %cst_129 [1] : vector<32x32xf32> to vector<32xf32>
    %241 = vector.shape_cast %240 : vector<32xf32> to vector<32x1xf32>
    %c0_130 = arith.constant 0 : index
    %c0_131 = arith.constant 0 : index
    %242 = vector.load %arg11[%c0_130, %c0_131] : memref<1x1xf32, #tpu.memory_space<vmem>>, vector<1x1xf32>
    %243 = vector.broadcast %242 : vector<1x1xf32> to vector<32x1xf32>
    %244 = arith.addf %241, %243 : vector<32x1xf32>
    %c0_132 = arith.constant 0 : index
    %c0_133 = arith.constant 0 : index
    %c0_134 = arith.constant 0 : index
    %245 = vector.load %arg12[%c0_132, %c0_133, %c0_134] : memref<1x32x1xf32, #tpu.memory_space<vmem>>, vector<1x32x1xf32>
    %246 = vector.shape_cast %245 : vector<1x32x1xf32> to vector<32x1xf32>
    %247 = vector.shape_cast %244 : vector<32x1xf32> to vector<1x32x1xf32>
    tpu.vector_store %arg12[%c0_132, %c0_133, %c0_134], %247 {strides = array<i32>} : memref<1x32x1xf32, #tpu.memory_space<vmem>>, vector<1x32x1xf32>,
    return
  }
  func.func @transform_0(%arg0: i32, %arg1: i32) -> (i32, i32, i32) {
    %c0_i32 = arith.constant 0 : i32
    %c0_i32_0 = arith.constant 0 : i32
    return %arg0, %arg1, %c0_i32 : i32, i32, i32
  }
  func.func @transform_1(%arg0: i32, %arg1: i32) -> (i32, i32) {
    %c0_i32 = arith.constant 0 : i32
    %c0_i32_0 = arith.constant 0 : i32
    %c0_i32_1 = arith.constant 0 : i32
    return %c0_i32, %c0_i32_0 : i32, i32
  }
  func.func @transform_2(%arg0: i32, %arg1: i32) -> (i32, i32) {
    %c0_i32 = arith.constant 0 : i32
    %c0_i32_0 = arith.constant 0 : i32
    %c0_i32_1 = arith.constant 0 : i32
    return %c0_i32, %c0_i32_0 : i32, i32
  }
  func.func @transform_3(%arg0: i32, %arg1: i32) -> (i32, i32, i32) {
    %c0_i32 = arith.constant 0 : i32
    %c0_i32_0 = arith.constant 0 : i32
    %c0_i32_1 = arith.constant 0 : i32
    %c0_i32_2 = arith.constant 0 : i32
    return %c0_i32, %c0_i32_0, %c0_i32_1 : i32, i32, i32
  }
  func.func @transform_4(%arg0: i32, %arg1: i32) -> (i32, i32, i32) {
    %c0_i32 = arith.constant 0 : i32
    %c0_i32_0 = arith.constant 0 : i32
    %c0_i32_1 = arith.constant 0 : i32
    %c0_i32_2 = arith.constant 0 : i32
    return %c0_i32, %c0_i32_0, %c0_i32_1 : i32, i32, i32
  }
  func.func @transform_5(%arg0: i32, %arg1: i32) -> (i32, i32, i32) {
    %c0_i32 = arith.constant 0 : i32
    %c0_i32_0 = arith.constant 0 : i32
    %c0_i32_1 = arith.constant 0 : i32
    %c0_i32_2 = arith.constant 0 : i32
    return %c0_i32, %c0_i32_0, %c0_i32_1 : i32, i32, i32
  }
  func.func @transform_6(%arg0: i32, %arg1: i32) -> (i32, i32) {
    %c0_i32 = arith.constant 0 : i32
    %c0_i32_0 = arith.constant 0 : i32
    %c0_i32_1 = arith.constant 0 : i32
    return %c0_i32, %c0_i32_0 : i32, i32
  }
  func.func @transform_7(%arg0: i32, %arg1: i32) -> (i32, i32) {
    %c0_i32 = arith.constant 0 : i32
    %c0_i32_0 = arith.constant 0 : i32
    %c0_i32_1 = arith.constant 0 : i32
    return %c0_i32, %c0_i32_0 : i32, i32
  }
  func.func @transform_8(%arg0: i32, %arg1: i32) -> (i32, i32) {
    %c0_i32 = arith.constant 0 : i32
    %c0_i32_0 = arith.constant 0 : i32
    %c0_i32_1 = arith.constant 0 : i32
    return %c0_i32, %c0_i32_0 : i32, i32
  }
  func.func @transform_9(%arg0: i32, %arg1: i32) -> (i32, i32) {
    %c0_i32 = arith.constant 0 : i32
    %c0_i32_0 = arith.constant 0 : i32
    %c0_i32_1 = arith.constant 0 : i32
    return %c0_i32, %c0_i32_0 : i32, i32
  }
  func.func @transform_10(%arg0: i32, %arg1: i32) -> (i32, i32, i32) {
    %c0_i32 = arith.constant 0 : i32
    %c0_i32_0 = arith.constant 0 : i32
    return %arg0, %arg1, %c0_i32 : i32, i32, i32
  }
}

</mosaic_0001>

<bundles_post_ra>
// kernel: tpu_custom_call.1
= control target key start
LH: loop header
LB: loop body
LE: loop exit
PB: predicated region body
PF: predicated region fallthrough
CT: control target
= control target key end

     0   :  { %s3473_s0 = inlined_call_operand.vmem [shape: bf16[2,64,128], index: 0, kind: input, shape index: {}]   ;;  %s3474_s1 = inlined_call_operand.vmem [shape: bf16[128,32], index: 1, kind: input, shape index: {}]   ;;  %s3475_s2 = inlined_call_operand.vmem [shape: f32[1,32], index: 2, kind: input, shape index: {}]   ;;  %s3476_s3 = inlined_call_operand.hbm [shape: bf16[7,32,64], index: 3, kind: input, shape index: {}]   ;;  %s3477_s4 = inlined_call_operand.hbm [shape: bf16[7,32,64], index: 4, kind: input, shape index: {}]   ;;  %s3478_s5 = inlined_call_operand.hbm [shape: f32[7,1,64], index: 5, kind: input, shape index: {}]   ;;  %s3479_s6 = inlined_call_operand.vmem [shape: bf16[32,32], index: 6, kind: input, shape index: {}]   ;;  %s3480_s7 = inlined_call_operand.vmem [shape: f32[1,32], index: 7, kind: input, shape index: {}]   ;;  %s3481_s8 = inlined_call_operand.vmem [shape: f32[1,32], index: 8, kind: input, shape index: {}]   ;;  %s3482_s9 = inlined_call_operand.<no memory space> [shape: f32[1,1], index: 9, kind: input, shape index: {}]   ;;  %s3483_s10 = inlined_call_operand.vmem [shape: f32[2,64,1], index: 10, kind: output, shape index: {}]  }
   0x1   :  { %3484 = sst [smem:[#allocation11_spill]] %s3477_s4  ;;  %v15_v0 = vstv %s3482_s9 }
   0x2   :  { %16 = vst [vmem:[#allocation3] sm:$0x1] %v15_v0 }
   0x3   :  { %17 = vsyncpa [#allocation5], 0 }
   0x4   :  { %18 = vsyncpa [#allocation7], 0  ;;  %s2981_s15 = smov 0   ;;  %s2983_s16 = smov 0  }
   0x5   :  { %s2985_s17 = smov 0   ;;  %s2987_s18 = smov 0  }
   0x6   :  { %s2989_s19 = smov 0  }
   0x7 LB: > { %s2320_s9 = sadd.s32 4294967295, %s2912_s19   ;;  %p2322_p0 = scmp.ge.s32.totalorder %s2912_s19, 1  ;;  %s2912_s19 = sphi %s2989_s19, %s24_s19   ;;  %s2908_s18 = sphi %s2987_s18, %s3492_s18   ;;  %s2904_s17 = sphi %s2985_s17, %s3491_s17   ;;  %s2900_s16 = sphi %s2983_s16, %s3490_s16   ;;  %s2896_s15 = sphi %s2981_s15, %s3489_s15  }
   0x8   : > { %p286_p1 = scmp.lt.s32.totalorder %s2912_s19, 5  ;;  %p3009_p2 = scmp.eq.s32.totalorder %s2320_s9, 0 }
   0x9   : > { %s3486_s4 = sld [smem:[#allocation11_spill]]  ;;  %s2914_s25 = smov [#allocation6]  }
   0xa   : > { %p3016_p3 = pnand %p2322_p0, %p286_p1  ;;  %s319_s26 = sshll.u32 %s2914_s25, 4  ;;  %s320_s26 = int_to_ptr.vmem [resolvable:$true] %s319_s26 }
   0xb   : > { %s2915_s28 = smov 64   ;;  %s2916_s29 = smov 4  }
   0xc   : > { %p2588_p4 = pneg %p3016_p3  ;;  %s33_s30 = sadd.s32 1, %s2904_s17 }
   0xd   : > { %s36_s11 = sadd.s32 1, %s2908_s18  ;;  %p34_p6 = scmp.ge.s32.totalorder %s33_s30, 2 }
   0xe   : > { %p3024_p5 = pnand %p3009_p2, %p2588_p4  ;;  %s303_s14 = sshll.u32 %s3476_s3, 4  ;;  %s304_s14 = int_to_ptr.hbm [resolvable:$true] %s303_s14 }
   0xf   : > { %s317_s23 = sshll.u32 %s3486_s4, 4  ;;  %s3494_s30 = smov (%p34_p6, %s33_s30), 0  ;;  %s318_s23 = int_to_ptr.hbm [resolvable:$true] %s317_s23 }
  0x10   : > { %2594 = dma.hbm_to_vmem [thread:$0]  (!%p3024_p5), %s318_s23, 1792, %s320_s26, [#allocation7], %s2915_s28, %s2915_s28, %s2916_s29  }
  0x11   : > { %s3496_s11 = smov (!%p34_p6, %s36_s11), %s2908_s18  ;;  %s2917_s9 = smov [#allocation4]  }
  0x12   : > { %s305_s21 = sshll.u32 %s2917_s9, 4  ;;  %s331_s4 = sshll.u32 %s3478_s5, 4  ;;  %s306_s21 = int_to_ptr.vmem [resolvable:$true] %s305_s21  ;;  %s332_s4 = int_to_ptr.hbm [resolvable:$true] %s331_s4 }
  0x13   : > { %p38_p7 = scmp.ge.s32.totalorder %s3496_s11, 2  ;;  %s2918_s23 = smov [#allocation8]  }
  0x14   : > { %2591 = dma.hbm_to_vmem [thread:$0]  (!%p3024_p5), %s304_s14, 1792, %s306_s21, [#allocation5], %s2915_s28, %s2915_s28, %s2916_s29  }
  0x15   : > { %s3498_s11 = smov (%p38_p7, %s3496_s11), 0  ;;  %s333_s26 = sshll.u32 %s2918_s23, 4  ;;  %s334_s26 = int_to_ptr.vmem [resolvable:$true] %s333_s26 }
  0x16   : > { %s2919_s12 = smov 16   ;;  %s2920_s13 = smov 1  }
  0x17   : > { %2597 = dma.hbm_to_vmem [thread:$0]  (!%p3024_p5), %s332_s4, 112, %s334_s26, [#allocation7], %s2919_s12, %s2919_s12, %s2920_s13  }
  0x18   : > { %374 = sbr.rel (%p3016_p3) target bundleno = 2569 (0xa09), region = 60 }
  0x1d   : > { %2887 = dma.done.wait (%p3009_p2), [#allocation5], 1792  }
  0x1e   : > { %2889 = vsyncadd (%p3009_p2), [#allocation5], 4294965504 }
  0x1f   : > { %2891 = dma.done.wait (%p3009_p2), [#allocation7], 1904  }
  0x20   : > { %2893 = vsyncadd (%p3009_p2), [#allocation7], 4294965392  ;;  %s2331_s27 = sshll.u32 %s2896_s15, 2  ;;  %p432_p8 = scmp.lt.s32.totalorder %s2900_s16, 1 }
  0x21   : > { %p434_p9 = scmp.lt.s32.totalorder %s2331_s27, 7  ;;  %p2337_p10 = scmp.ne.s32.totalorder %s2896_s15, 0 }
  0x22   : > { %s3500_s16 = smov (!%p432_p8, %s2900_s16), 1 }
  0x23   : > { %s3502_s27 = smov (!%p434_p9, %s2331_s27), 7  ;;  %s2332_s4 = sshll.u32 %s3500_s16, 3 }
  0x24   : > { %s437_s24 = sadd.s32 %s2332_s4, %s3502_s27  ;;  %455 = sbr.rel (%p2337_p10) target bundleno = 48 (0x30), region = 76 }
  0x25   : > { %s2333_s28 = sshll.u32 %s437_s24, 2  ;;  %s2336_s29 = sshll.u32 %s437_s24, 3 }
  0x26   : > { %s3063_s21 = scalar_lea.vmem %s3473_s0, %s2333_s28  ;;  %s3068_s25 = scalar_lea.vmem %s3483_s10, %s2336_s29 }
  0x29   : > { %vm456_vm0 = vcmask 261120   ;;  %v2921_v1 = vmov 0.0  }
  0x2a   : > { %458 = vst.msk [vmem:[#allocation2 + $0x8] sm:$0xff] %vm456_vm0, %v2921_v1 }
  0x2b   : > { %460 = vst.msk [vmem:[#allocation2 + $0x18] sm:$0xff] %vm456_vm0, %v2921_v1 }
  0x2c   : > { %462 = vst.msk [vmem:[#allocation2 + $0x28] sm:$0xff] %vm456_vm0, %v2921_v1 }
  0x2d   : > { %464 = vst.msk [vmem:[#allocation2 + $0x38] sm:$0xff] %vm456_vm0, %v2921_v1 }
  0x2e   : > { %465 = vst.msk [vmem:[#allocation2 + $0x40] sm:$0xff] %vm456_vm0, %v2921_v1 }
  0x2f   : > { %466 = vst.msk [vmem:[#allocation2 + $0x48] sm:$0xff] %vm456_vm0, %v2921_v1 }
  0x30 PF: > { %v2547_v2 = vld [vmem:[%s3474_s1 + $0x38] sm:$0xff]  ;;  %v2546_v3 = vld [vmem:[%s3474_s1 + $0x30] sm:$0xff]  ;;  %v2545_v4 = vld [vmem:[%s3474_s1 + $0x28] sm:$0xff]  ;;  %vm596_vm1 = vcmask 261120   ;;  %vm632_vm2 = vsmask.f32 4352 }
  0x31   : > { %555 = vmatpush.bf16.msra.mxu0 %v2547_v2  ;;  %v2544_v5 = vld [vmem:[%s3474_s1 + $0x20] sm:$0xff]  ;;  %v2543_v6 = vld [vmem:[%s3474_s1 + $0x18] sm:$0xff]  ;;  %v2542_v7 = vld [vmem:[%s3474_s1 + $0x10] sm:$0xff] }
  0x32   : > { %v2541_v8 = vld [vmem:[%s3474_s1 + $0x8] sm:$0xff]  ;;  %v2540_v9 = vld [vmem:[%s3474_s1] sm:$0xff]  ;;  %v2548_v13 = vld [vmem:[#allocation4] sm:$0xff] }
  0x33   : > { %v2538_v10 = vld [vmem:[%s3063_s21] sm:$0xff]  ;;  %v2539_v11 = vld [vmem:[%s3063_s21 + $0x8] sm:$0xff]  ;;  %v2654_v49 = vld [vmem:[#allocation8] ss:$0 sm:$0xff]  ;;  %s2922_s21 = smov 96  }
  0x34   : > { %v2549_v12 = vld [vmem:[#allocation4 + $0x8] sm:$0xff]  ;;  %v2551_v14 = vld [vmem:[#allocation6 + $0x8] sm:$0xff]  ;;  %v2550_v15 = vld [vmem:[#allocation6] sm:$0xff] }
  0x35   : > { %556 = vmatpush.bf16.msra.mxu0 %v2546_v3  ;;  %609 = vmatpush.bf16.msra.mxu1 %v2549_v12  ;;  %v2653_v17 = vld [vmem:[%s3475_s2] ss:$0 sm:$0xff]  ;;  %v622_v21 = vld [vmem:[#allocation2 + $0x8] sm:$0xff] }
  0x36   : > { %2574 = vmatpush.bf16.msra.mxu3 %v2549_v12  ;;  %683 = vmatpush.bf16.msra.mxu2 %v2551_v14 }
  0x39   : > { %557 = vmatpush.bf16.msra.mxu0 %v2545_v4  ;;  %610 = vmatpush.bf16.msra.mxu1 %v2548_v13 }
  0x3a   : > { %2575 = vmatpush.bf16.msra.mxu3 %v2548_v13  ;;  %684 = vmatpush.bf16.msra.mxu2 %v2550_v15 }
  0x3d   : > { %558 = vmatpush.bf16.msra.mxu0 %v2544_v5 }
  0x41   : > { %559 = vmatpush.bf16.msra.mxu0 %v2543_v6 }
  0x45   : > { %560 = vmatpush.bf16.msra.mxu0 %v2542_v7 }
  0x49   : > { %561 = vmatpush.bf16.msra.mxu0 %v2541_v8 }
  0x4d   : > { %562 = vmatpush.bf16.msra.mxu0 %v2540_v9 }
  0x50   : > { %563 = vmatmul.bf16.vlgmr.msra.gmra.mxu0 %v2538_v10 }
  0x60   : > { %568 = vmatmul.bf16.gmra.mxu0 %v2539_v11 }
  0xcd   : > { %v564_v16 = vpop.f32.mrf.mxu0 }
  0xce   : > { %v3100_v19 = vadd.f32 %v2653_v17, %v564_v16 }
  0xd0   : > { %v625_v23 = vpack.c.bf16 %v3100_v19, %v622_v21 }
  0xd2   : > { %v634_v25 = vshrl.u32 %v625_v23, 16  ;;  %v637_v26 = vshll.u32 %v625_v23, 16 }
  0xd4   : > { %v636_v29 = vrot.slane %v634_v25, 3  ;;  %v639_v30 = vrot.slane %v637_v26, 4 }
  0xd5   : > { %v566_v18 = vpop.f32.mrf.mxu0 }
  0xd6   : > { %v3102_v20 = vadd.f32 %v2653_v17, %v566_v18  ;;  %v640_v37 = vor.u32 %v639_v30, %v636_v29 }
  0xd8   : > { %v574_v22 = vpack.c.bf16 %v3102_v20, %v3100_v19 }
  0xda   : > { %2386 = vmatmul.msk.bf16.vlgmr.msra.gmra.mxu1 %vm596_vm1, %v574_v22 }
  0xdd   : > { %v569_v24 = vpop.f32.mrf.mxu0 }
  0xde   : > { %v3108_v27 = vadd.f32 %v2653_v17, %v569_v24 }
  0xe0   : > { %v626_v28 = vpack.c.bf16 %v3108_v27, %v3102_v20 }
  0xe2   : > { %v642_v31 = vshrl.u32 %v626_v28, 16  ;;  %v645_v32 = vshll.u32 %v626_v28, 16 }
  0xe4   : > { %v644_v33 = vrot.slane %v642_v31, 3  ;;  %v647_v34 = vrot.slane %v645_v32, 4 }
  0xe5   : > { %v571_v35 = vpop.f32.mrf.mxu0 }
  0xe6   : > { %v3112_v36 = vadd.f32 %v2653_v17, %v571_v35  ;;  %v648_v38 = vor.u32 %v647_v34, %v644_v33 }
  0xe8   : > { %624 = vst.msk [vmem:[#allocation2 + $0x8] sm:$0xff] %vm596_vm1, %v3112_v36  ;;  %v627_v39 = vpack.c.bf16 %v3112_v36, %v3112_v36  ;;  %v649_v40 = vsel %vm632_vm2, %v640_v37, %v648_v38  ;;  %v575_v41 = vpack.c.bf16 %v3112_v36, %v3108_v27 }
  0xe9   : > { %2396 = vmatmul.msk.bf16.vlgmr.msra.gmra.mxu2 %vm596_vm1, %v649_v40 }
  0xea   : > { %2387 = vmatmul.msk.bf16.vlgmr.msra.gmra.mxu3 %vm596_vm1, %v575_v41  ;;  %v651_v42 = vshrl.u32 %v627_v39, 16  ;;  %v654_v43 = vshll.u32 %v627_v39, 16 }
  0xec   : > { %v653_v44 = vrot.slane %v651_v42, 3  ;;  %v656_v45 = vrot.slane %v654_v43, 4 }
  0xee   : > { %v657_v46 = vor.u32 %v656_v45, %v653_v44 }
  0xf0   : > { %v658_v47 = vsel %vm632_vm2, %v648_v38, %v657_v46 }
  0xf9   : > { %2397 = vmatmul.msk.bf16.gmra.mxu2 %vm596_vm1, %v658_v47 }
 0x157   : > { %v612_v48 = vpop.f32.mrf.mxu1 }
 0x158   : > { %v613_v50 = vadd.f32 %v2654_v49, %v612_v48 }
 0x15f   : > { %v614_v54 = vpop.f32.mrf.mxu1 }
 0x160   : > { %v615_v55 = vadd.f32 %v2654_v49, %v614_v54 }
 0x16c   : > { %v686_v51 = vpop.f32.mrf.mxu2 }
 0x16d   : > { %v3123_v52 = vadd.f32 %v686_v51, %v613_v50  ;;  %v617_v58 = vpop.f32.mrf.mxu3 }
 0x16e   : > { %v618_v62 = vadd.f32 %v2654_v49, %v617_v58 }
 0x16f   : > { %v2398_v53 = vmul.f32 -1.442695, %v3123_v52 }
 0x171   : > { %2664 = vpow2.f32 %v2398_v53 }
 0x174   : > { %v688_v56 = vpop.f32.mrf.mxu2 }
 0x175   : > { %v3126_v57 = vadd.f32 %v688_v56, %v615_v55  ;;  %v619_v5 = vpop.f32.mrf.mxu3 }
 0x176   : > { %v620_v7 = vadd.f32 %v2654_v49, %v619_v5 }
 0x177   : > { %v2665_v59 = vpop.eup %2664  ;;  %v2399_v60 = vmul.f32 -1.442695, %v3126_v57 }
 0x178   : > { %v716_v61 = vadd.f32 1.0, %v2665_v59 }
 0x179   : > { %2666 = vpow2.f32 %v2399_v60 }
 0x17a   : > { %2668 = vrcp.f32 %v716_v61  ;;  %v731_v10 = vand.u32 2147483648, %v716_v61  ;;  %v729_v13 = vand.u32 2147483647, %v716_v61  ;;  %vm725_vm4 = vweird.f32 %v716_v61 }
 0x17c   : > { %v691_v63 = vpop.f32.mrf.mxu2  ;;  %v732_v21 = vor.u32 1.1754944e-38, %v731_v10  ;;  %vm730_vm6 = vcmp.eq.f32.partialorder %v729_v13, 8.507059e+37  ;;  %v700_v13 = vmax.f32 %v3123_v52, 0.0 }
 0x17d   : > { %v3129_v0 = vadd.f32 %v691_v63, %v618_v62  ;;  %v2553_v63 = vld [vmem:[#allocation4 + $0x18] sm:$0xff] }
 0x17e   : > { %864 = vmatpush.bf16.msrb.mxu3 %v2553_v63 }
 0x17f   : > { %v2667_v1 = vpop.eup %2666  ;;  %v2400_v2 = vmul.f32 -1.442695, %v3129_v0  ;;  %v702_v5 = vmax.f32 %v3129_v0, 0.0 }
 0x180   : > { %v2669_v3 = vpop.eup %2668  ;;  %v717_v4 = vadd.f32 1.0, %v2667_v1  ;;  %v2552_v1 = vld [vmem:[#allocation4 + $0x10] sm:$0xff] }
 0x181   : > { %2670 = vpow2.f32 %v2400_v2  ;;  %v721_v6 = vmul.f32 %v2669_v3, %v716_v61  ;;  %vm726_vm3 = vweird.f32 %v2669_v3  ;;  %v2555_v2 = vld [vmem:[#allocation6 + $0x18] sm:$0xff] }
 0x182   : > { %2672 = vrcp.f32 %v717_v4  ;;  %vm727_vm5 = vmor %vm725_vm4, %vm726_vm3  ;;  %v746_v28 = vand.u32 2147483648, %v717_v4  ;;  %v744_v30 = vand.u32 2147483647, %v717_v4  ;;  %vm740_vm8 = vweird.f32 %v717_v4  ;;  %865 = vmatpush.bf16.msrb.mxu3 %v2552_v1  ;;  %922 = vmatpush.bf16.msrb.mxu1 %v2555_v2 }
 0x183   : > { %v722_v8 = vsub.f32 1.0, %v721_v6  ;;  %vm892_vm4 = vcmask 1044480  }
 0x184   : > { %v693_v9 = vpop.f32.mrf.mxu2  ;;  %v747_v35 = vor.u32 1.1754944e-38, %v746_v28  ;;  %vm745_vm10 = vcmp.eq.f32.partialorder %v744_v30, 8.507059e+37 }
 0x185   : > { %v3132_v11 = vadd.f32 %v693_v9, %v620_v7  ;;  %v723_v12 = vmul.f32 %v2669_v3, %v722_v8 }
 0x187   : > { %v2671_v14 = vpop.eup %2670  ;;  %v2401_v15 = vmul.f32 -1.442695, %v3132_v11  ;;  %v724_v16 = vadd.f32 %v2669_v3, %v723_v12  ;;  %v703_v28 = vmax.f32 %v3132_v11, 0.0 }
 0x188   : > { %v2673_v17 = vpop.eup %2672  ;;  %v718_v18 = vadd.f32 1.0, %v2671_v14 }
 0x189   : > { %2674 = vpow2.f32 %v2401_v15  ;;  %v728_v22 = vsel %vm727_vm5, %v2669_v3, %v724_v16  ;;  %v736_v23 = vmul.f32 %v2673_v17, %v717_v4  ;;  %vm741_vm7 = vweird.f32 %v2673_v17  ;;  %v2554_v3 = vld [vmem:[#allocation6 + $0x10] sm:$0xff] }
 0x18a   : > { %2676 = vrcp.f32 %v718_v18  ;;  %v733_v24 = vsel %vm730_vm6, %v732_v21, %v728_v22  ;;  %vm742_vm9 = vmor %vm740_vm8, %vm741_vm7  ;;  %v761_v42 = vand.u32 2147483648, %v718_v18  ;;  %v759_v44 = vand.u32 2147483647, %v718_v18  ;;  %923 = vmatpush.bf16.msrb.mxu1 %v2554_v3  ;;  %v878_v21 = vld [vmem:[#allocation2 + $0x18] sm:$0xff] }
 0x18b   : > { %784 = vrot.lane.b32.xlu0 %v733_v24, %s2922_s21  ;;  %v800_v25 = vsub.f32 1.0, %v733_v24  ;;  %v737_v26 = vsub.f32 1.0, %v736_v23  ;;  %vm755_vm12 = vweird.f32 %v718_v18 }
 0x18c   : > { %v762_v47 = vor.u32 1.1754944e-38, %v761_v42  ;;  %vm760_vm14 = vcmp.eq.f32.partialorder %v759_v44, 8.507059e+37 }
 0x18d   : > { %808 = vrot.lane.b32.xlu1 %v800_v25, %s2922_s21  ;;  %v738_v29 = vmul.f32 %v2673_v17, %v737_v26 }
 0x18f   : > { %v2675_v31 = vpop.eup %2674  ;;  %v739_v32 = vadd.f32 %v2673_v17, %v738_v29 }
 0x190   : > { %v2677_v33 = vpop.eup %2676  ;;  %v719_v34 = vadd.f32 1.0, %v2675_v31 }
 0x191   : > { %v743_v37 = vsel %vm742_vm9, %v2673_v17, %v739_v32  ;;  %v751_v38 = vmul.f32 %v2677_v33, %v718_v18  ;;  %vm756_vm11 = vweird.f32 %v2677_v33  ;;  %v701_v18 = vmax.f32 %v3126_v57, 0.0 }
 0x192   : > { %2678 = vrcp.f32 %v719_v34  ;;  %v748_v39 = vsel %vm745_vm10, %v747_v35, %v743_v37  ;;  %vm757_vm13 = vmor %vm755_vm12, %vm756_vm11  ;;  %v776_v53 = vand.u32 2147483648, %v719_v34  ;;  %v774_v55 = vand.u32 2147483647, %v719_v34 }
 0x193   : > { %v801_v40 = vsub.f32 1.0, %v748_v39  ;;  %786 = vrot.lane.b32.xlu0 %v748_v39, %s2922_s21  ;;  %v752_v41 = vsub.f32 1.0, %v751_v38  ;;  %vm770_vm0 = vweird.f32 %v719_v34 }
 0x194   : > { %v777_v58 = vor.u32 1.1754944e-38, %v776_v53  ;;  %vm775_vm3 = vcmp.eq.f32.partialorder %v774_v55, 8.507059e+37 }
 0x195   : > { %810 = vrot.lane.b32.xlu1 %v801_v40, %s2922_s21  ;;  %v753_v43 = vmul.f32 %v2677_v33, %v752_v41 }
 0x197   : > { %v754_v45 = vadd.f32 %v2677_v33, %v753_v43 }
 0x198   : > { %v2679_v46 = vpop.eup %2678 }
 0x199   : > { %v758_v48 = vsel %vm757_vm13, %v2677_v33, %v754_v45  ;;  %v766_v49 = vmul.f32 %v2679_v46, %v719_v34  ;;  %vm771_vm15 = vweird.f32 %v2679_v46 }
 0x19a   : > { %v763_v50 = vsel %vm760_vm14, %v762_v47, %v758_v48  ;;  %vm772_vm2 = vmor %vm770_vm0, %vm771_vm15 }
 0x19b   : > { %788 = vrot.lane.b32.xlu2 %v763_v50, %s2922_s21  ;;  %v767_v51 = vsub.f32 1.0, %v766_v49  ;;  %v802_v59 = vsub.f32 1.0, %v763_v50 }
 0x19d   : > { %v768_v54 = vmul.f32 %v2679_v46, %v767_v51 }
 0x19f   : > { %v769_v56 = vadd.f32 %v2679_v46, %v768_v54 }
 0x1a1   : > { %v773_v60 = vsel %vm772_vm2, %v2679_v46, %v769_v56 }
 0x1a2   : > { %v778_v61 = vsel %vm775_vm3, %v777_v58, %v773_v60 }
 0x1a3   : > { %812 = vrot.lane.b32.xlu2 %v802_v59, %s2922_s21  ;;  %v803_v62 = vsub.f32 1.0, %v778_v61  ;;  %790 = vrot.lane.b32.xlu0 %v778_v61, %s2922_s21 }
 0x1a5   : > { %814 = vrot.lane.b32.xlu1 %v803_v62, %s2922_s21 }
 0x1f5   : > { %v789_v4 = vpop.permute.xlu2 %788 }
 0x1f6   : > { %v798_v8 = vmul.f32 %v789_v4, %v702_v5 }
 0x1fd   : > { %v813_v6 = vpop.permute.xlu2 %812  ;;  %v785_v7 = vpop.permute.xlu0 %784 }
 0x1fe   : > { %v822_v9 = vmul.f32 %v813_v6, %v3108_v27  ;;  %v796_v15 = vmul.f32 %v785_v7, %v700_v13 }
 0x1ff   : > { %v809_v10 = vpop.permute.xlu1 %808 }
 0x200   : > { %v3145_v12 = vadd.f32 %v822_v9, %v798_v8  ;;  %v820_v14 = vmul.f32 %v809_v10, %v3100_v19 }
 0x202   : > { %v3149_v17 = vadd.f32 %v820_v14, %v796_v15 }
 0x204   : > { %v881_v27 = vpack.c.bf16 %v3149_v17, %v878_v21 }
 0x205   : > { %v787_v16 = vpop.permute.xlu0 %786 }
 0x206   : > { %v797_v22 = vmul.f32 %v787_v16, %v701_v18  ;;  %v893_v25 = vrot.slane %v881_v27, 3 }
 0x207   : > { %v811_v0 = vpop.permute.xlu1 %810 }
 0x208   : > { %v821_v23 = vmul.f32 %v811_v0, %v3102_v20 }
 0x20a   : > { %v3154_v24 = vadd.f32 %v821_v23, %v797_v22 }
 0x20c   : > { %v828_v52 = vpack.c.bf16 %v3154_v24, %v3149_v17  ;;  %v882_v19 = vpack.c.bf16 %v3145_v12, %v3154_v24 }
 0x20e   : > { %v894_v26 = vrot.slane %v882_v19, 3  ;;  %2410 = vmatmul.msk.bf16.vlgmr.msrb.gmra.mxu3 %vm596_vm1, %v828_v52 }
 0x210   : > { %v895_v57 = vsel %vm892_vm4, %v893_v25, %v894_v26 }
 0x211   : > { %2420 = vmatmul.msk.bf16.vlgmr.msrb.gmra.mxu1 %vm596_vm1, %v895_v57 }
 0x215   : > { %v791_v20 = vpop.permute.xlu0 %790 }
 0x216   : > { %v799_v30 = vmul.f32 %v791_v20, %v703_v28 }
 0x217   : > { %v815_v29 = vpop.permute.xlu1 %814 }
 0x218   : > { %v823_v31 = vmul.f32 %v815_v29, %v3112_v36  ;;  %v2655_v36 = vld [vmem:[#allocation8 + $0x1] ss:$0 sm:$0xff] }
 0x21a   : > { %v3165_v32 = vadd.f32 %v823_v31, %v799_v30 }
 0x21c   : > { %880 = vst.msk [vmem:[#allocation2 + $0x18] sm:$0xff] %vm596_vm1, %v3165_v32  ;;  %v829_v33 = vpack.c.bf16 %v3165_v32, %v3145_v12  ;;  %v883_v34 = vpack.c.bf16 %v3165_v32, %v3165_v32 }
 0x21e   : > { %2411 = vmatmul.msk.bf16.gmra.mxu3 %vm596_vm1, %v829_v33  ;;  %v896_v35 = vrot.slane %v883_v34, 3 }
 0x220   : > { %v897_v11 = vsel %vm892_vm4, %v894_v26, %v896_v35 }
 0x221   : > { %2421 = vmatmul.msk.bf16.gmra.mxu1 %vm596_vm1, %v897_v11 }
 0x28e   : > { %v925_v37 = vpop.f32.mrf.mxu1 }
 0x291   : > { %v867_v38 = vpop.f32.mrf.mxu3 }
 0x292   : > { %v868_v39 = vadd.f32 %v2655_v36, %v867_v38 }
 0x294   : > { %v3176_v40 = vadd.f32 %v925_v37, %v868_v39 }
 0x296   : > { %v2422_v41 = vmul.f32 -1.442695, %v3176_v40  ;;  %v927_v42 = vpop.f32.mrf.mxu1 }
 0x298   : > { %2680 = vpow2.f32 %v2422_v41 }
 0x299   : > { %v869_v43 = vpop.f32.mrf.mxu3 }
 0x29a   : > { %v870_v44 = vadd.f32 %v2655_v36, %v869_v43 }
 0x29c   : > { %v3179_v45 = vadd.f32 %v927_v42, %v870_v44 }
 0x29e   : > { %v2681_v46 = vpop.eup %2680  ;;  %v2423_v47 = vmul.f32 -1.442695, %v3179_v45  ;;  %v930_v49 = vpop.f32.mrf.mxu1 }
 0x29f   : > { %v955_v48 = vadd.f32 1.0, %v2681_v46 }
 0x2a0   : > { %2682 = vpow2.f32 %v2423_v47 }
 0x2a1   : > { %2684 = vrcp.f32 %v955_v48  ;;  %v872_v50 = vpop.f32.mrf.mxu3  ;;  %v970_v1 = vand.u32 2147483648, %v955_v48  ;;  %v968_v4 = vand.u32 2147483647, %v955_v48  ;;  %vm964_vm6 = vweird.f32 %v955_v48 }
 0x2a2   : > { %v873_v51 = vadd.f32 %v2655_v36, %v872_v50 }
 0x2a3   : > { %v971_v10 = vor.u32 1.1754944e-38, %v970_v1  ;;  %vm969_vm8 = vcmp.eq.f32.partialorder %v968_v4, 8.507059e+37 }
 0x2a4   : > { %v3182_v53 = vadd.f32 %v930_v49, %v873_v51  ;;  %v2557_v51 = vld [vmem:[#allocation4 + $0x28] sm:$0xff] }
 0x2a5   : > { %1103 = vmatpush.bf16.msrb.mxu2 %v2557_v51 }
 0x2a6   : > { %v2683_v54 = vpop.eup %2682  ;;  %v2424_v55 = vmul.f32 -1.442695, %v3182_v53  ;;  %v932_v63 = vpop.f32.mrf.mxu1 }
 0x2a7   : > { %v2685_v56 = vpop.eup %2684  ;;  %v956_v58 = vadd.f32 1.0, %v2683_v54  ;;  %v2559_v54 = vld [vmem:[#allocation6 + $0x28] sm:$0xff] }
 0x2a8   : > { %2686 = vpow2.f32 %v2424_v55  ;;  %v960_v59 = vmul.f32 %v2685_v56, %v955_v48  ;;  %vm965_vm5 = vweird.f32 %v2685_v56  ;;  %1161 = vmatpush.bf16.msra.mxu3 %v2559_v54  ;;  %v2556_v55 = vld [vmem:[#allocation4 + $0x20] sm:$0xff] }
 0x2a9   : > { %2688 = vrcp.f32 %v956_v58  ;;  %v874_v60 = vpop.f32.mrf.mxu3  ;;  %vm966_vm7 = vmor %vm964_vm6, %vm965_vm5  ;;  %v985_v18 = vand.u32 2147483648, %v956_v58  ;;  %v983_v0 = vand.u32 2147483647, %v956_v58  ;;  %vm979_vm10 = vweird.f32 %v956_v58  ;;  %1104 = vmatpush.bf16.msrb.mxu2 %v2556_v55 }
 0x2aa   : > { %v875_v61 = vadd.f32 %v2655_v36, %v874_v60  ;;  %v961_v62 = vsub.f32 1.0, %v960_v59  ;;  %vm1131_vm6 = vcmask 1045504  }
 0x2ab   : > { %v986_v19 = vor.u32 1.1754944e-38, %v985_v18  ;;  %vm984_vm12 = vcmp.eq.f32.partialorder %v983_v0, 8.507059e+37 }
 0x2ac   : > { %v3185_v2 = vadd.f32 %v932_v63, %v875_v61  ;;  %v962_v3 = vmul.f32 %v2685_v56, %v961_v62  ;;  %v939_v61 = vmax.f32 %v3176_v40, 0.0  ;;  %v940_v63 = vmax.f32 %v3179_v45, 0.0 }
 0x2ae   : > { %v2687_v5 = vpop.eup %2686  ;;  %v2425_v6 = vmul.f32 -1.442695, %v3185_v2  ;;  %v963_v7 = vadd.f32 %v2685_v56, %v962_v3 }
 0x2af   : > { %v2689_v8 = vpop.eup %2688  ;;  %v957_v9 = vadd.f32 1.0, %v2687_v5 }
 0x2b0   : > { %2690 = vpow2.f32 %v2425_v6  ;;  %v967_v13 = vsel %vm966_vm7, %v2685_v56, %v963_v7  ;;  %v975_v14 = vmul.f32 %v2689_v8, %v956_v58  ;;  %vm980_vm9 = vweird.f32 %v2689_v8  ;;  %v2558_v56 = vld [vmem:[#allocation6 + $0x20] sm:$0xff] }
 0x2b1   : > { %2692 = vrcp.f32 %v957_v9  ;;  %v972_v15 = vsel %vm969_vm8, %v971_v10, %v967_v13  ;;  %vm981_vm11 = vmor %vm979_vm10, %vm980_vm9  ;;  %v1000_v29 = vand.u32 2147483648, %v957_v9  ;;  %v998_v31 = vand.u32 2147483647, %v957_v9  ;;  %1162 = vmatpush.bf16.msra.mxu3 %v2558_v56 }
 0x2b2   : > { %1023 = vrot.lane.b32.xlu2 %v972_v15, %s2922_s21  ;;  %v976_v16 = vsub.f32 1.0, %v975_v14  ;;  %v1039_v25 = vsub.f32 1.0, %v972_v15  ;;  %vm994_vm14 = vweird.f32 %v957_v9  ;;  %v941_v10 = vmax.f32 %v3182_v53, 0.0 }
 0x2b3   : > { %v1001_v35 = vor.u32 1.1754944e-38, %v1000_v29  ;;  %vm999_vm0 = vcmp.eq.f32.partialorder %v998_v31, 8.507059e+37  ;;  %v942_v13 = vmax.f32 %v3185_v2, 0.0 }
 0x2b4   : > { %v977_v21 = vmul.f32 %v2689_v8, %v976_v16 }
 0x2b6   : > { %v2691_v22 = vpop.eup %2690  ;;  %v978_v23 = vadd.f32 %v2689_v8, %v977_v21 }
 0x2b7   : > { %v2693_v27 = vpop.eup %2692  ;;  %v958_v52 = vadd.f32 1.0, %v2691_v22 }
 0x2b8   : > { %v982_v26 = vsel %vm981_vm11, %v2689_v8, %v978_v23  ;;  %v990_v57 = vmul.f32 %v2693_v27, %v957_v9  ;;  %vm995_vm13 = vweird.f32 %v2693_v27 }
 0x2b9   : > { %2694 = vrcp.f32 %v958_v52  ;;  %v987_v20 = vsel %vm984_vm12, %v986_v19, %v982_v26  ;;  %vm996_vm15 = vmor %vm994_vm14, %vm995_vm13  ;;  %v1015_v41 = vand.u32 2147483648, %v958_v52  ;;  %v1013_v43 = vand.u32 2147483647, %v958_v52  ;;  %v2656_v26 = vld [vmem:[#allocation8 + $0x2] ss:$0 sm:$0xff] }
 0x2ba   : > { %1025 = vrot.lane.b32.xlu0 %v987_v20, %s2922_s21  ;;  %1047 = vrot.lane.b32.xlu2 %v1039_v25, %s2922_s21  ;;  %v991_v28 = vsub.f32 1.0, %v990_v57  ;;  %v1040_v11 = vsub.f32 1.0, %v987_v20  ;;  %vm1009_vm3 = vweird.f32 %v958_v52 }
 0x2bb   : > { %v1016_v46 = vor.u32 1.1754944e-38, %v1015_v41  ;;  %vm1014_vm5 = vcmp.eq.f32.partialorder %v1013_v43, 8.507059e+37 }
 0x2bc   : > { %v992_v30 = vmul.f32 %v2693_v27, %v991_v28 }
 0x2be   : > { %v993_v33 = vadd.f32 %v2693_v27, %v992_v30 }
 0x2bf   : > { %v2695_v34 = vpop.eup %2694 }
 0x2c0   : > { %v997_v37 = vsel %vm996_vm15, %v2693_v27, %v993_v33  ;;  %v1005_v36 = vmul.f32 %v2695_v34, %v958_v52  ;;  %vm1010_vm2 = vweird.f32 %v2695_v34 }
 0x2c1   : > { %v1002_v38 = vsel %vm999_vm0, %v1001_v35, %v997_v37  ;;  %vm1011_vm4 = vmor %vm1009_vm3, %vm1010_vm2 }
 0x2c2   : > { %1027 = vrot.lane.b32.xlu1 %v1002_v38, %s2922_s21  ;;  %1049 = vrot.lane.b32.xlu0 %v1040_v11, %s2922_s21  ;;  %v1006_v39 = vsub.f32 1.0, %v1005_v36  ;;  %v1041_v47 = vsub.f32 1.0, %v1002_v38 }
 0x2c4   : > { %v1007_v42 = vmul.f32 %v2695_v34, %v1006_v39 }
 0x2c6   : > { %v1008_v44 = vadd.f32 %v2695_v34, %v1007_v42 }
 0x2c8   : > { %v1012_v48 = vsel %vm1011_vm4, %v2695_v34, %v1008_v44 }
 0x2c9   : > { %v1017_v49 = vsel %vm1014_vm5, %v1016_v46, %v1012_v48 }
 0x2ca   : > { %1051 = vrot.lane.b32.xlu1 %v1041_v47, %s2922_s21  ;;  %v1042_v50 = vsub.f32 1.0, %v1017_v49  ;;  %1029 = vrot.lane.b32.xlu2 %v1017_v49, %s2922_s21 }
 0x2cc   : > { %1053 = vrot.lane.b32.xlu0 %v1042_v50, %s2922_s21 }
 0x30c   : > { %v1024_v58 = vpop.permute.xlu2 %1023 }
 0x30d   : > { %v1035_v4 = vmul.f32 %v1024_v58, %v939_v61 }
 0x314   : > { %v1048_v60 = vpop.permute.xlu2 %1047 }
 0x315   : > { %v1059_v62 = vmul.f32 %v1048_v60, %v3149_v17  ;;  %v1117_v17 = vld [vmem:[#allocation2 + $0x28] sm:$0xff] }
 0x317   : > { %v3200_v7 = vadd.f32 %v1059_v62, %v1035_v4 }
 0x319   : > { %v1120_v16 = vpack.c.bf16 %v3200_v7, %v1117_v17 }
 0x31b   : > { %v1132_v23 = vrot.slane %v1120_v16, 2 }
 0x324   : > { %v1030_v40 = vpop.permute.xlu2 %1029 }
 0x325   : > { %v1038_v18 = vmul.f32 %v1030_v40, %v942_v13 }
 0x32c   : > { %v1026_v59 = vpop.permute.xlu0 %1025 }
 0x32d   : > { %v1036_v5 = vmul.f32 %v1026_v59, %v940_v63 }
 0x334   : > { %v1028_v1 = vpop.permute.xlu1 %1027  ;;  %v1050_v3 = vpop.permute.xlu0 %1049 }
 0x335   : > { %v1060_v6 = vmul.f32 %v1050_v3, %v3154_v24  ;;  %v1037_v14 = vmul.f32 %v1028_v1, %v941_v10 }
 0x337   : > { %v3202_v8 = vadd.f32 %v1060_v6, %v1036_v5 }
 0x339   : > { %v1067_v9 = vpack.c.bf16 %v3202_v8, %v3200_v7 }
 0x33b   : > { %2434 = vmatmul.msk.bf16.vlgmr.msrb.gmra.mxu2 %vm596_vm1, %v1067_v9 }
 0x33c   : > { %v1052_v45 = vpop.permute.xlu1 %1051 }
 0x33d   : > { %v1061_v15 = vmul.f32 %v1052_v45, %v3145_v12 }
 0x33e   : > { %v1054_v24 = vpop.permute.xlu0 %1053 }
 0x33f   : > { %v3211_v21 = vadd.f32 %v1061_v15, %v1037_v14  ;;  %v1062_v0 = vmul.f32 %v1054_v24, %v3165_v32 }
 0x341   : > { %v1121_v53 = vpack.c.bf16 %v3211_v21, %v3202_v8  ;;  %v3216_v22 = vadd.f32 %v1062_v0, %v1038_v18 }
 0x343   : > { %1119 = vst.msk [vmem:[#allocation2 + $0x28] sm:$0xff] %vm596_vm1, %v3216_v22  ;;  %v1133_v2 = vrot.slane %v1121_v53, 2  ;;  %v1068_v27 = vpack.c.bf16 %v3216_v22, %v3211_v21  ;;  %v1122_v32 = vpack.c.bf16 %v3216_v22, %v3216_v22 }
 0x345   : > { %v1134_v12 = vsel %vm1131_vm6, %v1132_v23, %v1133_v2  ;;  %v1135_v52 = vrot.slane %v1122_v32, 2 }
 0x346   : > { %2444 = vmatmul.msk.bf16.vlgmr.msra.gmra.mxu3 %vm596_vm1, %v1134_v12 }
 0x347   : > { %v1136_v19 = vsel %vm1131_vm6, %v1133_v2, %v1135_v52 }
 0x34b   : > { %2435 = vmatmul.msk.bf16.gmra.mxu2 %vm596_vm1, %v1068_v27 }
 0x356   : > { %2445 = vmatmul.msk.bf16.gmra.mxu3 %vm596_vm1, %v1136_v19 }
 0x3be   : > { %v1106_v25 = vpop.f32.mrf.mxu2 }
 0x3bf   : > { %v1107_v57 = vadd.f32 %v2656_v26, %v1106_v25 }
 0x3c6   : > { %v1108_v20 = vpop.f32.mrf.mxu2 }
 0x3c7   : > { %v1109_v31 = vadd.f32 %v2656_v26, %v1108_v20 }
 0x3c9   : > { %v1164_v28 = vpop.f32.mrf.mxu3 }
 0x3ca   : > { %v3227_v29 = vadd.f32 %v1164_v28, %v1107_v57 }
 0x3cc   : > { %v2446_v30 = vmul.f32 -1.442695, %v3227_v29 }
 0x3ce   : > { %2696 = vpow2.f32 %v2446_v30  ;;  %v1111_v35 = vpop.f32.mrf.mxu2 }
 0x3cf   : > { %v1112_v38 = vadd.f32 %v2656_v26, %v1111_v35 }
 0x3d1   : > { %v1166_v33 = vpop.f32.mrf.mxu3 }
 0x3d2   : > { %v3230_v34 = vadd.f32 %v1166_v33, %v1109_v31 }
 0x3d4   : > { %v2697_v11 = vpop.eup %2696  ;;  %v2447_v37 = vmul.f32 -1.442695, %v3230_v34 }
 0x3d5   : > { %v1194_v36 = vadd.f32 1.0, %v2697_v11 }
 0x3d6   : > { %2698 = vpow2.f32 %v2447_v37  ;;  %v1113_v47 = vpop.f32.mrf.mxu2 }
 0x3d7   : > { %2700 = vrcp.f32 %v1194_v36  ;;  %v1114_v49 = vadd.f32 %v2656_v26, %v1113_v47  ;;  %v1209_v54 = vand.u32 2147483648, %v1194_v36  ;;  %v1207_v58 = vand.u32 2147483647, %v1194_v36 }
 0x3d8   : > { %vm1203_vm8 = vweird.f32 %v1194_v36  ;;  %v1178_v47 = vmax.f32 %v3227_v29, 0.0 }
 0x3d9   : > { %v1169_v39 = vpop.f32.mrf.mxu3  ;;  %v1210_v1 = vor.u32 1.1754944e-38, %v1209_v54  ;;  %vm1208_vm10 = vcmp.eq.f32.partialorder %v1207_v58, 8.507059e+37  ;;  %v1356_v54 = vld [vmem:[#allocation2 + $0x38] sm:$0xff] }
 0x3da   : > { %v3233_v41 = vadd.f32 %v1169_v39, %v1112_v38  ;;  %v2561_v39 = vld [vmem:[#allocation4 + $0x38] sm:$0xff] }
 0x3db   : > { %1342 = vmatpush.bf16.msrb.mxu0 %v2561_v39 }
 0x3dc   : > { %v2699_v42 = vpop.eup %2698  ;;  %v2448_v43 = vmul.f32 -1.442695, %v3233_v41 }
 0x3dd   : > { %v2701_v44 = vpop.eup %2700  ;;  %v1195_v46 = vadd.f32 1.0, %v2699_v42  ;;  %v2563_v42 = vld [vmem:[#allocation6 + $0x38] sm:$0xff] }
 0x3de   : > { %2702 = vpow2.f32 %v2448_v43  ;;  %v1199_v48 = vmul.f32 %v2701_v44, %v1194_v36  ;;  %vm1204_vm7 = vweird.f32 %v2701_v44  ;;  %1390 = vmatpush.bf16.msra.mxu1 %v2563_v42  ;;  %v2560_v43 = vld [vmem:[#allocation4 + $0x30] sm:$0xff] }
 0x3df   : > { %2704 = vrcp.f32 %v1195_v46  ;;  %vm1205_vm9 = vmor %vm1203_vm8, %vm1204_vm7  ;;  %v1224_v10 = vand.u32 2147483648, %v1195_v46  ;;  %v1222_v40 = vand.u32 2147483647, %v1195_v46  ;;  %vm1218_vm12 = vweird.f32 %v1195_v46  ;;  %1343 = vmatpush.bf16.msrb.mxu0 %v2560_v43 }
 0x3e0   : > { %v1200_v50 = vsub.f32 1.0, %v1199_v48 }
 0x3e1   : > { %v1171_v51 = vpop.f32.mrf.mxu3  ;;  %v1225_v24 = vor.u32 1.1754944e-38, %v1224_v10  ;;  %vm1223_vm14 = vcmp.eq.f32.partialorder %v1222_v40, 8.507059e+37 }
 0x3e2   : > { %v3236_v55 = vadd.f32 %v1171_v51, %v1114_v49  ;;  %v1201_v56 = vmul.f32 %v2701_v44, %v1200_v50 }
 0x3e4   : > { %v2703_v59 = vpop.eup %2702  ;;  %v2449_v60 = vmul.f32 -1.442695, %v3236_v55  ;;  %v1202_v61 = vadd.f32 %v2701_v44, %v1201_v56 }
 0x3e5   : > { %v2705_v62 = vpop.eup %2704  ;;  %v1196_v63 = vadd.f32 1.0, %v2703_v59  ;;  %v1179_v59 = vmax.f32 %v3230_v34, 0.0 }
 0x3e6   : > { %2706 = vpow2.f32 %v2449_v60  ;;  %v1206_v3 = vsel %vm1205_vm9, %v2701_v44, %v1202_v61  ;;  %v1214_v4 = vmul.f32 %v2705_v62, %v1195_v46  ;;  %vm1219_vm11 = vweird.f32 %v2705_v62  ;;  %v2562_v44 = vld [vmem:[#allocation6 + $0x30] sm:$0xff] }
 0x3e7   : > { %2708 = vrcp.f32 %v1196_v63  ;;  %v1211_v5 = vsel %vm1208_vm10, %v1210_v1, %v1206_v3  ;;  %vm1220_vm13 = vmor %vm1218_vm12, %vm1219_vm11  ;;  %v1239_v2 = vand.u32 2147483648, %v1196_v63  ;;  %v1237_v27 = vand.u32 2147483647, %v1196_v63  ;;  %1391 = vmatpush.bf16.msra.mxu1 %v2562_v44 }
 0x3e8   : > { %1262 = vrot.lane.b32.xlu1 %v1211_v5, %s2922_s21  ;;  %v1278_v6 = vsub.f32 1.0, %v1211_v5  ;;  %v1215_v9 = vsub.f32 1.0, %v1214_v4  ;;  %vm1233_vm0 = vweird.f32 %v1196_v63  ;;  %v1180_v1 = vmax.f32 %v3233_v41, 0.0 }
 0x3e9   : > { %v1240_v19 = vor.u32 1.1754944e-38, %v1239_v2  ;;  %vm1238_vm3 = vcmp.eq.f32.partialorder %v1237_v27, 8.507059e+37 }
 0x3ea   : > { %1286 = vrot.lane.b32.xlu0 %v1278_v6, %s2922_s21  ;;  %v1216_v17 = vmul.f32 %v2705_v62, %v1215_v9  ;;  %v1181_v9 = vmax.f32 %v3236_v55, 0.0 }
 0x3ec   : > { %v2707_v45 = vpop.eup %2706  ;;  %v1217_v13 = vadd.f32 %v2705_v62, %v1216_v17 }
 0x3ed   : > { %v2709_v14 = vpop.eup %2708  ;;  %v1197_v15 = vadd.f32 1.0, %v2707_v45  ;;  %v2657_v45 = vld [vmem:[#allocation8 + $0x3] ss:$0 sm:$0xff] }
 0x3ee   : > { %v1221_v16 = vsel %vm1220_vm13, %v2705_v62, %v1217_v13  ;;  %v1229_v18 = vmul.f32 %v2709_v14, %v1196_v63  ;;  %vm1234_vm15 = vweird.f32 %v2709_v14 }
 0x3ef   : > { %2710 = vrcp.f32 %v1197_v15  ;;  %v1226_v0 = vsel %vm1223_vm14, %v1225_v24, %v1221_v16  ;;  %vm1235_vm2 = vmor %vm1233_vm0, %vm1234_vm15  ;;  %v1254_v30 = vand.u32 2147483648, %v1197_v15  ;;  %v1252_v33 = vand.u32 2147483647, %v1197_v15 }
 0x3f0   : > { %1264 = vrot.lane.b32.xlu2 %v1226_v0, %s2922_s21  ;;  %v1279_v53 = vsub.f32 1.0, %v1226_v0  ;;  %v1230_v23 = vsub.f32 1.0, %v1229_v18  ;;  %vm1248_vm5 = vweird.f32 %v1197_v15 }
 0x3f1   : > { %v1255_v11 = vor.u32 1.1754944e-38, %v1254_v30  ;;  %vm1253_vm7 = vcmp.eq.f32.partialorder %v1252_v33, 8.507059e+37 }
 0x3f2   : > { %1288 = vrot.lane.b32.xlu1 %v1279_v53, %s2922_s21  ;;  %v1231_v12 = vmul.f32 %v2709_v14, %v1230_v23 }
 0x3f4   : > { %v1232_v32 = vadd.f32 %v2709_v14, %v1231_v12 }
 0x3f5   : > { %v2711_v52 = vpop.eup %2710 }
 0x3f6   : > { %v1236_v25 = vsel %vm1235_vm2, %v2709_v14, %v1232_v32  ;;  %v1244_v26 = vmul.f32 %v2711_v52, %v1197_v15  ;;  %vm1249_vm4 = vweird.f32 %v2711_v52 }
 0x3f7   : > { %v1241_v57 = vsel %vm1238_vm3, %v1240_v19, %v1236_v25  ;;  %vm1250_vm6 = vmor %vm1248_vm5, %vm1249_vm4 }
 0x3f8   : > { %v1280_v20 = vsub.f32 1.0, %v1241_v57  ;;  %1266 = vrot.lane.b32.xlu2 %v1241_v57, %s2922_s21  ;;  %v1245_v28 = vsub.f32 1.0, %v1244_v26 }
 0x3fa   : > { %1290 = vrot.lane.b32.xlu1 %v1280_v20, %s2922_s21  ;;  %v1246_v31 = vmul.f32 %v2711_v52, %v1245_v28 }
 0x3fc   : > { %v1247_v35 = vadd.f32 %v2711_v52, %v1246_v31 }
 0x3fe   : > { %v1251_v37 = vsel %vm1250_vm6, %v2711_v52, %v1247_v35 }
 0x3ff   : > { %v1256_v36 = vsel %vm1253_vm7, %v1255_v11, %v1251_v37 }
 0x400   : > { %v1281_v38 = vsub.f32 1.0, %v1256_v36  ;;  %1268 = vrot.lane.b32.xlu0 %v1256_v36, %s2922_s21 }
 0x402   : > { %1292 = vrot.lane.b32.xlu2 %v1281_v38, %s2922_s21 }
 0x44a   : > { %v1265_v51 = vpop.permute.xlu2 %1264 }
 0x44b   : > { %v1275_v61 = vmul.f32 %v1265_v51, %v1179_v59 }
 0x452   : > { %v1267_v29 = vpop.permute.xlu2 %1266 }
 0x453   : > { %v1276_v4 = vmul.f32 %v1267_v29, %v1180_v1 }
 0x45a   : > { %v1263_v46 = vpop.permute.xlu1 %1262 }
 0x45b   : > { %v1274_v49 = vmul.f32 %v1263_v46, %v1178_v47 }
 0x45c   : > { %v1287_v48 = vpop.permute.xlu0 %1286  ;;  %v1293_v6 = vpop.permute.xlu2 %1292 }
 0x45d   : > { %v1298_v50 = vmul.f32 %v1287_v48, %v3200_v7  ;;  %v1301_v17 = vmul.f32 %v1293_v6, %v3216_v22 }
 0x45f   : > { %v3249_v56 = vadd.f32 %v1298_v50, %v1274_v49 }
 0x461   : > { %v1359_v58 = vpack.c.bf16 %v3249_v56, %v1356_v54 }
 0x463   : > { %2468 = vmatmul.msk.bf16.vlgmr.msra.gmra.mxu1 %vm596_vm1, %v1359_v58 }
 0x464   : > { %v1289_v60 = vpop.permute.xlu1 %1288 }
 0x465   : > { %v1299_v62 = vmul.f32 %v1289_v60, %v3202_v8 }
 0x467   : > { %v3255_v63 = vadd.f32 %v1299_v62, %v1275_v61 }
 0x469   : > { %v1306_v7 = vpack.c.bf16 %v3255_v63, %v3249_v56 }
 0x46b   : > { %2458 = vmatmul.msk.bf16.vlgmr.msrb.gmra.mxu0 %vm596_vm1, %v1306_v7 }
 0x46c   : > { %v1291_v3 = vpop.permute.xlu1 %1290 }
 0x46d   : > { %v1300_v34 = vmul.f32 %v1291_v3, %v3211_v21 }
 0x46f   : > { %v3262_v5 = vadd.f32 %v1300_v34, %v1276_v4 }
 0x471   : > { %v1360_v8 = vpack.c.bf16 %v3262_v5, %v3255_v63 }
 0x472   : > { %v1269_v10 = vpop.permute.xlu0 %1268 }
 0x473   : > { %v1277_v40 = vmul.f32 %v1269_v10, %v1181_v9  ;;  %2469 = vmatmul.msk.bf16.gmra.mxu1 %vm596_vm1, %v1360_v8 }
 0x475   : > { %v3269_v41 = vadd.f32 %v1301_v17, %v1277_v40 }
 0x477   : > { %1358 = vst.msk [vmem:[#allocation2 + $0x38] sm:$0xff] %vm596_vm1, %v3269_v41  ;;  %v1307_v21 = vpack.c.bf16 %v3269_v41, %v3262_v5 }
 0x47b   : > { %2459 = vmatmul.msk.bf16.gmra.mxu0 %vm596_vm1, %v1307_v21 }
 0x4e0   : > { %v1393_v55 = vpop.f32.mrf.mxu1 }
 0x4e8   : > { %v1345_v13 = vpop.f32.mrf.mxu0  ;;  %v1395_v24 = vpop.f32.mrf.mxu1 }
 0x4e9   : > { %v1346_v14 = vadd.f32 %v2657_v45, %v1345_v13 }
 0x4eb   : > { %v3276_v15 = vadd.f32 %v1393_v55, %v1346_v14 }
 0x4ed   : > { %v2470_v22 = vmul.f32 -1.442695, %v3276_v15 }
 0x4ef   : > { %2712 = vpow2.f32 %v2470_v22 }
 0x4f0   : > { %v1347_v16 = vpop.f32.mrf.mxu0  ;;  %v1398_v12 = vpop.f32.mrf.mxu1 }
 0x4f1   : > { %v1348_v18 = vadd.f32 %v2657_v45, %v1347_v16 }
 0x4f3   : > { %v3279_v0 = vadd.f32 %v1395_v24, %v1348_v18 }
 0x4f5   : > { %v2713_v53 = vpop.eup %2712  ;;  %v2471_v23 = vmul.f32 -1.442695, %v3279_v0 }
 0x4f6   : > { %v1423_v2 = vadd.f32 1.0, %v2713_v53 }
 0x4f7   : > { %2714 = vpow2.f32 %v2471_v23 }
 0x4f8   : > { %2716 = vrcp.f32 %v1423_v2  ;;  %v1350_v27 = vpop.f32.mrf.mxu0  ;;  %v1400_v33 = vpop.f32.mrf.mxu1  ;;  %v1438_v35 = vand.u32 2147483648, %v1423_v2  ;;  %v1436_v36 = vand.u32 2147483647, %v1423_v2  ;;  %vm1432_vm9 = vweird.f32 %v1423_v2 }
 0x4f9   : > { %v1351_v32 = vadd.f32 %v2657_v45, %v1350_v27 }
 0x4fa   : > { %v1439_v46 = vor.u32 1.1754944e-38, %v1438_v35  ;;  %vm1437_vm11 = vcmp.eq.f32.partialorder %v1436_v36, 8.507059e+37  ;;  %v1408_v36 = vmax.f32 %v3279_v0, 0.0 }
 0x4fb   : > { %v3282_v52 = vadd.f32 %v1398_v12, %v1351_v32  ;;  %v2565_v32 = vld [vmem:[#allocation4 + $0x48] sm:$0xff] }
 0x4fc   : > { %1571 = vmatpush.bf16.msra.mxu2 %v2565_v32 }
 0x4fd   : > { %v2715_v19 = vpop.eup %2714  ;;  %v2472_v25 = vmul.f32 -1.442695, %v3282_v52 }
 0x4fe   : > { %v2717_v26 = vpop.eup %2716  ;;  %v1424_v57 = vadd.f32 1.0, %v2715_v19  ;;  %v2567_v19 = vld [vmem:[#allocation6 + $0x48] sm:$0xff] }
 0x4ff   : > { %2718 = vpow2.f32 %v2472_v25  ;;  %v1428_v20 = vmul.f32 %v2717_v26, %v1423_v2  ;;  %vm1433_vm8 = vweird.f32 %v2717_v26  ;;  %1616 = vmatpush.bf16.msrb.mxu3 %v2567_v19  ;;  %v2566_v25 = vld [vmem:[#allocation6 + $0x40] sm:$0xff] }
 0x500   : > { %2720 = vrcp.f32 %v1424_v57  ;;  %v1352_v28 = vpop.f32.mrf.mxu0  ;;  %vm1434_vm10 = vmor %vm1432_vm9, %vm1433_vm8  ;;  %v1453_v54 = vand.u32 2147483648, %v1424_v57  ;;  %v1451_v59 = vand.u32 2147483647, %v1424_v57  ;;  %vm1447_vm13 = vweird.f32 %v1424_v57 }
 0x501   : > { %v1353_v30 = vadd.f32 %v2657_v45, %v1352_v28  ;;  %v1429_v31 = vsub.f32 1.0, %v1428_v20  ;;  %v2564_v28 = vld [vmem:[#allocation4 + $0x40] sm:$0xff] }
 0x502   : > { %v1454_v7 = vor.u32 1.1754944e-38, %v1453_v54  ;;  %vm1452_vm15 = vcmp.eq.f32.partialorder %v1451_v59, 8.507059e+37  ;;  %1572 = vmatpush.bf16.msra.mxu2 %v2564_v28 }
 0x503   : > { %v3285_v11 = vadd.f32 %v1400_v33, %v1353_v30  ;;  %v1430_v37 = vmul.f32 %v2717_v26, %v1429_v31  ;;  %1617 = vmatpush.bf16.msrb.mxu3 %v2566_v25  ;;  %v1407_v31 = vmax.f32 %v3276_v15, 0.0  ;;  %v1409_v15 = vmax.f32 %v3282_v52, 0.0 }
 0x505   : > { %v2719_v38 = vpop.eup %2718  ;;  %v2473_v39 = vmul.f32 -1.442695, %v3285_v11  ;;  %v1431_v42 = vadd.f32 %v2717_v26, %v1430_v37 }
 0x506   : > { %v2721_v43 = vpop.eup %2720  ;;  %v1425_v44 = vadd.f32 1.0, %v2719_v38 }
 0x507   : > { %2722 = vpow2.f32 %v2473_v39  ;;  %v1435_v47 = vsel %vm1434_vm10, %v2717_v26, %v1431_v42  ;;  %v1443_v48 = vmul.f32 %v2721_v43, %v1424_v57  ;;  %vm1448_vm12 = vweird.f32 %v2721_v43  ;;  %v1585_v26 = vld [vmem:[#allocation2 + $0x40] sm:$0xff]  ;;  %v1586_v57 = vld [vmem:[#allocation2 + $0x48] sm:$0xff] }
 0x508   : > { %2724 = vrcp.f32 %v1425_v44  ;;  %v1440_v49 = vsel %vm1437_vm11, %v1439_v46, %v1435_v47  ;;  %vm1449_vm14 = vmor %vm1447_vm13, %vm1448_vm12  ;;  %v1468_v9 = vand.u32 2147483648, %v1425_v44  ;;  %v1466_v10 = vand.u32 2147483647, %v1425_v44 }
 0x509   : > { %1491 = vrot.lane.b32.xlu0 %v1440_v49, %s2922_s21  ;;  %v1507_v50 = vsub.f32 1.0, %v1440_v49  ;;  %v1444_v51 = vsub.f32 1.0, %v1443_v48  ;;  %vm1462_vm2 = vweird.f32 %v1425_v44  ;;  %v1589_v20 = vpack.c.bf16 %v1586_v57, %v1585_v26 }
 0x50a   : > { %v1469_v21 = vor.u32 1.1754944e-38, %v1468_v9  ;;  %vm1467_vm4 = vcmp.eq.f32.partialorder %v1466_v10, 8.507059e+37 }
 0x50b   : > { %1515 = vrot.lane.b32.xlu2 %v1507_v50, %s2922_s21  ;;  %v1445_v58 = vmul.f32 %v2721_v43, %v1444_v51  ;;  %2492 = vmatmul.msk.bf16.vlgmr.msrb.gmra.mxu3 %vm596_vm1, %v1589_v20  ;;  %v1410_v51 = vmax.f32 %v3285_v11, 0.0 }
 0x50d   : > { %v2723_v60 = vpop.eup %2722  ;;  %v1446_v61 = vadd.f32 %v2721_v43, %v1445_v58 }
 0x50e   : > { %v2725_v62 = vpop.eup %2724  ;;  %v1426_v29 = vadd.f32 1.0, %v2723_v60 }
 0x50f   : > { %v1450_v1 = vsel %vm1449_vm14, %v2721_v43, %v1446_v61  ;;  %v1458_v3 = vmul.f32 %v2725_v62, %v1425_v44  ;;  %vm1463_vm0 = vweird.f32 %v2725_v62  ;;  %v2658_v61 = vld [vmem:[#allocation8 + $0x4] ss:$0 sm:$0xff] }
 0x510   : > { %2726 = vrcp.f32 %v1426_v29  ;;  %v1455_v4 = vsel %vm1452_vm15, %v1454_v7, %v1450_v1  ;;  %vm1464_vm3 = vmor %vm1462_vm2, %vm1463_vm0  ;;  %v1483_v24 = vand.u32 2147483648, %v1426_v29  ;;  %v1481_v18 = vand.u32 2147483647, %v1426_v29 }
 0x511   : > { %1493 = vrot.lane.b32.xlu1 %v1455_v4, %s2922_s21  ;;  %v1508_v34 = vsub.f32 1.0, %v1455_v4  ;;  %v1459_v6 = vsub.f32 1.0, %v1458_v3  ;;  %vm1477_vm6 = vweird.f32 %v1426_v29 }
 0x512   : > { %v1484_v23 = vor.u32 1.1754944e-38, %v1483_v24  ;;  %vm1482_vm8 = vcmp.eq.f32.partialorder %v1481_v18, 8.507059e+37 }
 0x513   : > { %1517 = vrot.lane.b32.xlu0 %v1508_v34, %s2922_s21  ;;  %v1460_v8 = vmul.f32 %v2725_v62, %v1459_v6 }
 0x515   : > { %v1461_v17 = vadd.f32 %v2725_v62, %v1460_v8 }
 0x516   : > { %v2727_v40 = vpop.eup %2726 }
 0x517   : > { %v1465_v55 = vsel %vm1464_vm3, %v2725_v62, %v1461_v17  ;;  %v1473_v45 = vmul.f32 %v2727_v40, %v1426_v29  ;;  %vm1478_vm5 = vweird.f32 %v2727_v40 }
 0x518   : > { %v1470_v13 = vsel %vm1467_vm4, %v1469_v21, %v1465_v55  ;;  %vm1479_vm7 = vmor %vm1477_vm6, %vm1478_vm5 }
 0x519   : > { %v1509_v14 = vsub.f32 1.0, %v1470_v13  ;;  %1495 = vrot.lane.b32.xlu1 %v1470_v13, %s2922_s21  ;;  %v1474_v22 = vsub.f32 1.0, %v1473_v45 }
 0x51b   : > { %1519 = vrot.lane.b32.xlu0 %v1509_v14, %s2922_s21  ;;  %v1475_v16 = vmul.f32 %v2727_v40, %v1474_v22 }
 0x51d   : > { %v1476_v53 = vadd.f32 %v2727_v40, %v1475_v16 }
 0x51f   : > { %v1480_v2 = vsel %vm1479_vm7, %v2727_v40, %v1476_v53 }
 0x520   : > { %v1485_v12 = vsel %vm1482_vm8, %v1484_v23, %v1480_v2 }
 0x521   : > { %v1510_v27 = vsub.f32 1.0, %v1485_v12  ;;  %1497 = vrot.lane.b32.xlu2 %v1485_v12, %s2922_s21 }
 0x523   : > { %1521 = vrot.lane.b32.xlu1 %v1510_v27, %s2922_s21 }
 0x565   : > { %v1516_v33 = vpop.permute.xlu2 %1515 }
 0x566   : > { %v1527_v39 = vmul.f32 %v1516_v33, %v3249_v56 }
 0x57b   : > { %v1492_v30 = vpop.permute.xlu0 %1491 }
 0x57c   : > { %v1503_v37 = vmul.f32 %v1492_v30, %v1407_v31 }
 0x57e   : > { %v3301_v44 = vadd.f32 %v1527_v39, %v1503_v37 }
 0x583   : > { %v1494_v35 = vpop.permute.xlu1 %1493 }
 0x584   : > { %v1504_v42 = vmul.f32 %v1494_v35, %v1408_v36 }
 0x585   : > { %v1518_v38 = vpop.permute.xlu0 %1517 }
 0x586   : > { %v1528_v43 = vmul.f32 %v1518_v38, %v3255_v63  ;;  %v1498_v63 = vpop.permute.xlu2 %1497 }
 0x587   : > { %v1506_v58 = vmul.f32 %v1498_v63, %v1410_v51 }
 0x588   : > { %v3303_v46 = vadd.f32 %v1528_v43, %v1504_v42 }
 0x58a   : > { %v1535_v47 = vpack.c.bf16 %v3303_v46, %v3301_v44 }
 0x58b   : > { %v1496_v48 = vpop.permute.xlu1 %1495 }
 0x58c   : > { %2482 = vmatmul.msk.bf16.vlgmr.msra.gmra.mxu2 %vm596_vm1, %v1535_v47  ;;  %2493 = vmatmul.msk.bf16.gmra.mxu3 %vm596_vm1, %v1535_v47  ;;  %v1505_v49 = vmul.f32 %v1496_v48, %v1409_v15 }
 0x58d   : > { %v1520_v0 = vpop.permute.xlu0 %1519 }
 0x58e   : > { %v1529_v56 = vmul.f32 %v1520_v0, %v3262_v5  ;;  %v1619_v60 = vpop.f32.mrf.mxu3 }
 0x590   : > { %v3311_v50 = vadd.f32 %v1529_v56, %v1505_v49 }
 0x592   : > { %1587 = vst.msk [vmem:[#allocation2 + $0x40] sm:$0xff] %vm596_vm1, %v3311_v50 }
 0x595   : > { %v1522_v54 = vpop.permute.xlu1 %1521 }
 0x596   : > { %v1530_v52 = vmul.f32 %v1522_v54, %v3269_v41  ;;  %v1621_v1 = vpop.f32.mrf.mxu3 }
 0x598   : > { %v3317_v59 = vadd.f32 %v1530_v52, %v1506_v58 }
 0x59a   : > { %1588 = vst.msk [vmem:[#allocation2 + $0x48] sm:$0xff] %vm596_vm1, %v3317_v59  ;;  %v1536_v5 = vpack.c.bf16 %v3317_v59, %v3311_v50 }
 0x59c   : > { %2483 = vmatmul.msk.bf16.gmra.mxu2 %vm596_vm1, %v1536_v5 }
 0x60f   : > { %v1574_v62 = vpop.f32.mrf.mxu2  ;;  %v1624_v8 = vpop.f32.mrf.mxu3 }
 0x610   : > { %v1575_v29 = vadd.f32 %v2658_v61, %v1574_v62 }
 0x612   : > { %v3324_v7 = vadd.f32 %v1619_v60, %v1575_v29 }
 0x614   : > { %v2494_v11 = vmul.f32 -1.442695, %v3324_v7 }
 0x616   : > { %2728 = vpow2.f32 %v2494_v11 }
 0x617   : > { %v1576_v41 = vpop.f32.mrf.mxu2  ;;  %v1626_v18 = vpop.f32.mrf.mxu3 }
 0x618   : > { %v1577_v3 = vadd.f32 %v2658_v61, %v1576_v41 }
 0x61a   : > { %v3327_v4 = vadd.f32 %v1621_v1, %v1577_v3 }
 0x61c   : > { %v2729_v34 = vpop.eup %2728  ;;  %v2495_v6 = vmul.f32 -1.442695, %v3327_v4 }
 0x61d   : > { %v1649_v9 = vadd.f32 1.0, %v2729_v34 }
 0x61e   : > { %2730 = vpow2.f32 %v2495_v6 }
 0x61f   : > { %2732 = vrcp.f32 %v1649_v9  ;;  %v1579_v10 = vpop.f32.mrf.mxu2  ;;  %v1664_v53 = vand.u32 2147483648, %v1649_v9  ;;  %v1662_v12 = vand.u32 2147483647, %v1649_v9  ;;  %vm1658_vm10 = vweird.f32 %v1649_v9 }
 0x620   : > { %v1580_v17 = vadd.f32 %v2658_v61, %v1579_v10 }
 0x621   : > { %v1665_v57 = vor.u32 1.1754944e-38, %v1664_v53  ;;  %vm1663_vm12 = vcmp.eq.f32.partialorder %v1662_v12, 8.507059e+37 }
 0x622   : > { %v3330_v40 = vadd.f32 %v1624_v8, %v1580_v17  ;;  %v2569_v17 = vld [vmem:[#allocation4 + $0x58] sm:$0xff] }
 0x623   : > { %1797 = vmatpush.bf16.msra.mxu0 %v2569_v17 }
 0x624   : > { %v2731_v21 = vpop.eup %2730  ;;  %v2496_v55 = vmul.f32 -1.442695, %v3330_v40 }
 0x625   : > { %v2733_v45 = vpop.eup %2732  ;;  %v1650_v13 = vadd.f32 1.0, %v2731_v21  ;;  %v2568_v21 = vld [vmem:[#allocation4 + $0x50] sm:$0xff] }
 0x626   : > { %2734 = vpow2.f32 %v2496_v55  ;;  %v1654_v14 = vmul.f32 %v2733_v45, %v1649_v9  ;;  %vm1659_vm9 = vweird.f32 %v2733_v45 }
 0x627   : > { %2736 = vrcp.f32 %v1650_v13  ;;  %v1581_v22 = vpop.f32.mrf.mxu2  ;;  %vm1660_vm11 = vmor %vm1658_vm10, %vm1659_vm9  ;;  %v1679_v35 = vand.u32 2147483648, %v1650_v13  ;;  %v1677_v36 = vand.u32 2147483647, %v1650_v13  ;;  %vm1673_vm14 = vweird.f32 %v1650_v13  ;;  %1798 = vmatpush.bf16.msra.mxu0 %v2568_v21 }
 0x628   : > { %v1582_v24 = vadd.f32 %v2658_v61, %v1581_v22  ;;  %v1655_v16 = vsub.f32 1.0, %v1654_v14  ;;  %v1633_v14 = vmax.f32 %v3324_v7, 0.0  ;;  %v1635_v7 = vmax.f32 %v3330_v40, 0.0  ;;  %v2659_v40 = vld [vmem:[#allocation8 + $0x5] ss:$0 sm:$0xff] }
 0x629   : > { %v1680_v47 = vor.u32 1.1754944e-38, %v1679_v35  ;;  %vm1678_vm0 = vcmp.eq.f32.partialorder %v1677_v36, 8.507059e+37 }
 0x62a   : > { %v3333_v23 = vadd.f32 %v1626_v18, %v1582_v24  ;;  %v1656_v2 = vmul.f32 %v2733_v45, %v1655_v16  ;;  %v1634_v24 = vmax.f32 %v3327_v4, 0.0 }
 0x62c   : > { %v2735_v27 = vpop.eup %2734  ;;  %v2497_v32 = vmul.f32 -1.442695, %v3333_v23  ;;  %v1657_v19 = vadd.f32 %v2733_v45, %v1656_v2 }
 0x62d   : > { %v2737_v25 = vpop.eup %2736  ;;  %v1651_v26 = vadd.f32 1.0, %v2735_v27 }
 0x62e   : > { %2738 = vpow2.f32 %v2497_v32  ;;  %v1661_v20 = vsel %vm1660_vm11, %v2733_v45, %v1657_v19  ;;  %v1669_v28 = vmul.f32 %v2737_v25, %v1650_v13  ;;  %vm1674_vm13 = vweird.f32 %v2737_v25 }
 0x62f   : > { %2740 = vrcp.f32 %v1651_v26  ;;  %v1666_v30 = vsel %vm1663_vm12, %v1665_v57, %v1661_v20  ;;  %vm1675_vm15 = vmor %vm1673_vm14, %vm1674_vm13  ;;  %v1694_v63 = vand.u32 2147483648, %v1651_v26  ;;  %v1692_v54 = vand.u32 2147483647, %v1651_v26 }
 0x630   : > { %1717 = vrot.lane.b32.xlu2 %v1666_v30, %s2922_s21  ;;  %v1733_v31 = vsub.f32 1.0, %v1666_v30  ;;  %v1670_v33 = vsub.f32 1.0, %v1669_v28  ;;  %vm1688_vm3 = vweird.f32 %v1651_v26 }
 0x631   : > { %v1695_v5 = vor.u32 1.1754944e-38, %v1694_v63  ;;  %vm1693_vm5 = vcmp.eq.f32.partialorder %v1692_v54, 8.507059e+37 }
 0x632   : > { %1741 = vrot.lane.b32.xlu1 %v1733_v31, %s2922_s21  ;;  %v1671_v37 = vmul.f32 %v2737_v25, %v1670_v33 }
 0x634   : > { %v2739_v38 = vpop.eup %2738  ;;  %v1672_v39 = vadd.f32 %v2737_v25, %v1671_v37 }
 0x635   : > { %v2741_v42 = vpop.eup %2740  ;;  %v1652_v43 = vadd.f32 1.0, %v2739_v38 }
 0x636   : > { %v1676_v48 = vsel %vm1675_vm15, %v2737_v25, %v1672_v39  ;;  %v1684_v15 = vmul.f32 %v2741_v42, %v1651_v26  ;;  %vm1689_vm2 = vweird.f32 %v2741_v42  ;;  %v1636_v26 = vmax.f32 %v3333_v23, 0.0 }
 0x637   : > { %2742 = vrcp.f32 %v1652_v43  ;;  %v1681_v0 = vsel %vm1678_vm0, %v1680_v47, %v1676_v48  ;;  %vm1690_vm4 = vmor %vm1688_vm3, %vm1689_vm2  ;;  %v1709_v1 = vand.u32 2147483648, %v1652_v43  ;;  %v1707_v3 = vand.u32 2147483647, %v1652_v43 }
 0x638   : > { %1719 = vrot.lane.b32.xlu0 %v1681_v0, %s2922_s21  ;;  %v1734_v49 = vsub.f32 1.0, %v1681_v0  ;;  %v1685_v56 = vsub.f32 1.0, %v1684_v15  ;;  %vm1703_vm7 = vweird.f32 %v1652_v43 }
 0x639   : > { %v1710_v6 = vor.u32 1.1754944e-38, %v1709_v1  ;;  %vm1708_vm9 = vcmp.eq.f32.partialorder %v1707_v3, 8.507059e+37 }
 0x63a   : > { %1743 = vrot.lane.b32.xlu2 %v1734_v49, %s2922_s21  ;;  %v1686_v51 = vmul.f32 %v2741_v42, %v1685_v56 }
 0x63c   : > { %v1687_v58 = vadd.f32 %v2741_v42, %v1686_v51 }
 0x63d   : > { %v2743_v52 = vpop.eup %2742 }
 0x63e   : > { %v1691_v60 = vsel %vm1690_vm4, %v2741_v42, %v1687_v58  ;;  %v1699_v61 = vmul.f32 %v2743_v52, %v1652_v43  ;;  %vm1704_vm6 = vweird.f32 %v2743_v52 }
 0x63f   : > { %v1696_v62 = vsel %vm1693_vm5, %v1695_v5, %v1691_v60  ;;  %vm1705_vm8 = vmor %vm1703_vm7, %vm1704_vm6 }
 0x640   : > { %v1735_v29 = vsub.f32 1.0, %v1696_v62  ;;  %1721 = vrot.lane.b32.xlu0 %v1696_v62, %s2922_s21  ;;  %v1700_v11 = vsub.f32 1.0, %v1699_v61 }
 0x642   : > { %1745 = vrot.lane.b32.xlu2 %v1735_v29, %s2922_s21  ;;  %v1701_v41 = vmul.f32 %v2743_v52, %v1700_v11 }
 0x644   : > { %v1702_v34 = vadd.f32 %v2743_v52, %v1701_v41 }
 0x646   : > { %v1706_v9 = vsel %vm1705_vm8, %v2743_v52, %v1702_v34 }
 0x647   : > { %v1711_v8 = vsel %vm1708_vm9, %v1710_v6, %v1706_v9 }
 0x648   : > { %v1736_v10 = vsub.f32 1.0, %v1711_v8  ;;  %1723 = vrot.lane.b32.xlu1 %v1711_v8, %s2922_s21 }
 0x64a   : > { %1747 = vrot.lane.b32.xlu0 %v1736_v10, %s2922_s21 }
 0x68a   : > { %v1718_v55 = vpop.permute.xlu2 %1717 }
 0x68b   : > { %v1729_v18 = vmul.f32 %v1718_v55, %v1633_v14 }
 0x694   : > { %v1744_v13 = vpop.permute.xlu2 %1743 }
 0x695   : > { %v1754_v53 = vmul.f32 %v1744_v13, %v3303_v46 }
 0x6a4   : > { %v1742_v45 = vpop.permute.xlu1 %1741 }
 0x6a5   : > { %v1753_v22 = vmul.f32 %v1742_v45, %v3301_v44  ;;  %v1746_v44 = vpop.permute.xlu2 %1745 }
 0x6a6   : > { %v1755_v46 = vmul.f32 %v1746_v44, %v3311_v50 }
 0x6a7   : > { %v3348_v12 = vadd.f32 %v1753_v22, %v1729_v18 }
 0x6aa   : > { %v1720_v16 = vpop.permute.xlu0 %1719 }
 0x6ab   : > { %v1730_v2 = vmul.f32 %v1720_v16, %v1634_v24 }
 0x6ad   : > { %v3350_v27 = vadd.f32 %v1754_v53, %v1730_v2 }
 0x6af   : > { %v1761_v32 = vpack.c.bf16 %v3350_v27, %v3348_v12 }
 0x6b1   : > { %2506 = vmatmul.msk.bf16.vlgmr.msra.gmra.mxu0 %vm596_vm1, %v1761_v32 }
 0x6b2   : > { %v1722_v19 = vpop.permute.xlu0 %1721 }
 0x6b3   : > { %v1731_v4 = vmul.f32 %v1722_v19, %v1635_v7 }
 0x6b5   : > { %v3359_v30 = vadd.f32 %v1755_v46, %v1731_v4 }
 0x6ba   : > { %v1724_v25 = vpop.permute.xlu1 %1723 }
 0x6bb   : > { %v1732_v20 = vmul.f32 %v1724_v25, %v1636_v26 }
 0x6bc   : > { %v1748_v57 = vpop.permute.xlu0 %1747 }
 0x6bd   : > { %v1756_v28 = vmul.f32 %v1748_v57, %v3317_v59 }
 0x6bf   : > { %v3361_v31 = vadd.f32 %v1756_v28, %v1732_v20 }
 0x6c1   : > { %v1762_v33 = vpack.c.bf16 %v3361_v31, %v3359_v30 }
 0x6c3   : > { %2507 = vmatmul.msk.bf16.gmra.mxu0 %vm596_vm1, %v1762_v33 }
 0x72e   : > { %v1800_v35 = vpop.f32.mrf.mxu0 }
 0x72f   : > { %v3366_v37 = vadd.f32 %v2659_v40, %v1800_v35 }
 0x731   : > { %v2508_v23 = vmul.f32 -1.442695, %v3366_v37 }
 0x733   : > { %2744 = vpow2.f32 %v2508_v23 }
 0x736   : > { %v1802_v50 = vpop.f32.mrf.mxu0 }
 0x737   : > { %v3369_v36 = vadd.f32 %v2659_v40, %v1802_v50 }
 0x739   : > { %v2745_v59 = vpop.eup %2744  ;;  %v2509_v38 = vmul.f32 -1.442695, %v3369_v36 }
 0x73a   : > { %v1826_v39 = vadd.f32 1.0, %v2745_v59 }
 0x73b   : > { %2746 = vpow2.f32 %v2509_v38  ;;  %v2571_v38 = vld [vmem:[#allocation4 + $0x68] sm:$0xff] }
 0x73c   : > { %2748 = vrcp.f32 %v1826_v39  ;;  %v1841_v63 = vand.u32 2147483648, %v1826_v39  ;;  %v1839_v54 = vand.u32 2147483647, %v1826_v39  ;;  %vm1835_vm11 = vweird.f32 %v1826_v39  ;;  %1974 = vmatpush.bf16.msrb.mxu1 %v2571_v38 }
 0x73e   : > { %v1842_v61 = vor.u32 1.1754944e-38, %v1841_v63  ;;  %vm1840_vm13 = vcmp.eq.f32.partialorder %v1839_v54, 8.507059e+37 }
 0x740   : > { %v1805_v42 = vpop.f32.mrf.mxu0 }
 0x741   : > { %v2747_v43 = vpop.eup %2746  ;;  %v3372_v47 = vadd.f32 %v2659_v40, %v1805_v42 }
 0x742   : > { %v2749_v48 = vpop.eup %2748  ;;  %v1827_v15 = vadd.f32 1.0, %v2747_v43 }
 0x743   : > { %v2510_v0 = vmul.f32 -1.442695, %v3372_v47  ;;  %v1831_v49 = vmul.f32 %v2749_v48, %v1826_v39  ;;  %vm1836_vm10 = vweird.f32 %v2749_v48  ;;  %v2570_v39 = vld [vmem:[#allocation4 + $0x60] sm:$0xff] }
 0x744   : > { %2750 = vrcp.f32 %v1827_v15  ;;  %vm1837_vm12 = vmor %vm1835_vm11, %vm1836_vm10  ;;  %v1856_v9 = vand.u32 2147483648, %v1827_v15  ;;  %v1854_v10 = vand.u32 2147483647, %v1827_v15  ;;  %vm1850_vm15 = vweird.f32 %v1827_v15  ;;  %1975 = vmatpush.bf16.msrb.mxu1 %v2570_v39 }
 0x745   : > { %2752 = vpow2.f32 %v2510_v0  ;;  %v1832_v56 = vsub.f32 1.0, %v1831_v49  ;;  %v1810_v0 = vmax.f32 %v3366_v37, 0.0  ;;  %v1812_v37 = vmax.f32 %v3372_v47, 0.0 }
 0x746   : > { %v1857_v21 = vor.u32 1.1754944e-38, %v1856_v9  ;;  %vm1855_vm2 = vcmp.eq.f32.partialorder %v1854_v10, 8.507059e+37  ;;  %v2660_v9 = vld [vmem:[#allocation8 + $0x6] ss:$0 sm:$0xff] }
 0x747   : > { %v1833_v51 = vmul.f32 %v2749_v48, %v1832_v56 }
 0x748   : > { %v1807_v58 = vpop.f32.mrf.mxu0 }
 0x749   : > { %v3375_v52 = vadd.f32 %v2659_v40, %v1807_v58  ;;  %v1834_v5 = vadd.f32 %v2749_v48, %v1833_v51 }
 0x74a   : > { %v2751_v60 = vpop.eup %2750 }
 0x74b   : > { %v2753_v62 = vpop.eup %2752  ;;  %v2511_v29 = vmul.f32 -1.442695, %v3375_v52  ;;  %v1838_v11 = vsel %vm1837_vm12, %v2749_v48, %v1834_v5  ;;  %v1846_v1 = vmul.f32 %v2751_v60, %v1827_v15  ;;  %vm1851_vm14 = vweird.f32 %v2751_v60 }
 0x74c   : > { %v1828_v41 = vadd.f32 1.0, %v2753_v62  ;;  %v1843_v3 = vsel %vm1840_vm13, %v1842_v61, %v1838_v11  ;;  %vm1852_vm0 = vmor %vm1850_vm15, %vm1851_vm14  ;;  %v1811_v15 = vmax.f32 %v3369_v36, 0.0 }
 0x74d   : > { %2754 = vpow2.f32 %v2511_v29  ;;  %1894 = vrot.lane.b32.xlu1 %v1843_v3, %s2922_s21  ;;  %v1910_v34 = vsub.f32 1.0, %v1843_v3  ;;  %v1847_v6 = vsub.f32 1.0, %v1846_v1  ;;  %v1813_v29 = vmax.f32 %v3375_v52, 0.0 }
 0x74e   : > { %2756 = vrcp.f32 %v1828_v41  ;;  %v1871_v53 = vand.u32 2147483648, %v1828_v41  ;;  %v1869_v32 = vand.u32 2147483647, %v1828_v41  ;;  %vm1865_vm4 = vweird.f32 %v1828_v41 }
 0x74f   : > { %1918 = vrot.lane.b32.xlu0 %v1910_v34, %s2922_s21  ;;  %v1848_v8 = vmul.f32 %v2751_v60, %v1847_v6 }
 0x750   : > { %v1872_v44 = vor.u32 1.1754944e-38, %v1871_v53  ;;  %vm1870_vm6 = vcmp.eq.f32.partialorder %v1869_v32, 8.507059e+37 }
 0x751   : > { %v1849_v17 = vadd.f32 %v2751_v60, %v1848_v8 }
 0x753   : > { %v2755_v55 = vpop.eup %2754  ;;  %v1853_v45 = vsel %vm1852_vm0, %v2751_v60, %v1849_v17 }
 0x754   : > { %v2757_v13 = vpop.eup %2756  ;;  %v1829_v14 = vadd.f32 1.0, %v2755_v55  ;;  %v1858_v22 = vsel %vm1855_vm2, %v1857_v21, %v1853_v45 }
 0x755   : > { %1896 = vrot.lane.b32.xlu2 %v1858_v22, %s2922_s21  ;;  %v1911_v24 = vsub.f32 1.0, %v1858_v22  ;;  %v1861_v16 = vmul.f32 %v2757_v13, %v1828_v41  ;;  %vm1866_vm3 = vweird.f32 %v2757_v13 }
 0x756   : > { %2758 = vrcp.f32 %v1829_v14  ;;  %vm1867_vm5 = vmor %vm1865_vm4, %vm1866_vm3  ;;  %v1886_v20 = vand.u32 2147483648, %v1829_v14  ;;  %v1884_v33 = vand.u32 2147483647, %v1829_v14  ;;  %vm1880_vm8 = vweird.f32 %v1829_v14 }
 0x757   : > { %1920 = vrot.lane.b32.xlu1 %v1911_v24, %s2922_s21  ;;  %v1862_v18 = vsub.f32 1.0, %v1861_v16 }
 0x758   : > { %v1887_v35 = vor.u32 1.1754944e-38, %v1886_v20  ;;  %vm1885_vm10 = vcmp.eq.f32.partialorder %v1884_v33, 8.507059e+37 }
 0x759   : > { %v1863_v2 = vmul.f32 %v2757_v13, %v1862_v18 }
 0x75b   : > { %v1864_v19 = vadd.f32 %v2757_v13, %v1863_v2 }
 0x75c   : > { %v2759_v7 = vpop.eup %2758 }
 0x75d   : > { %v1868_v25 = vsel %vm1867_vm5, %v2757_v13, %v1864_v19  ;;  %v1876_v4 = vmul.f32 %v2759_v7, %v1829_v14  ;;  %vm1881_vm7 = vweird.f32 %v2759_v7 }
 0x75e   : > { %v1873_v26 = vsel %vm1870_vm6, %v1872_v44, %v1868_v25  ;;  %vm1882_vm9 = vmor %vm1880_vm8, %vm1881_vm7 }
 0x75f   : > { %v1912_v57 = vsub.f32 1.0, %v1873_v26  ;;  %1898 = vrot.lane.b32.xlu2 %v1873_v26, %s2922_s21  ;;  %v1877_v46 = vsub.f32 1.0, %v1876_v4 }
 0x761   : > { %1922 = vrot.lane.b32.xlu1 %v1912_v57, %s2922_s21  ;;  %v1878_v28 = vmul.f32 %v2759_v7, %v1877_v46 }
 0x763   : > { %v1879_v40 = vadd.f32 %v2759_v7, %v1878_v28 }
 0x765   : > { %v1883_v23 = vsel %vm1882_vm9, %v2759_v7, %v1879_v40 }
 0x766   : > { %v1888_v50 = vsel %vm1885_vm10, %v1887_v35, %v1883_v23 }
 0x767   : > { %v1913_v59 = vsub.f32 1.0, %v1888_v50  ;;  %1900 = vrot.lane.b32.xlu0 %v1888_v50, %s2922_s21 }
 0x769   : > { %1924 = vrot.lane.b32.xlu2 %v1913_v59, %s2922_s21 }
 0x7af   : > { %v1897_v48 = vpop.permute.xlu2 %1896 }
 0x7b0   : > { %v1907_v63 = vmul.f32 %v1897_v48, %v1811_v15 }
 0x7b9   : > { %v1899_v61 = vpop.permute.xlu2 %1898 }
 0x7bf   : > { %v1895_v42 = vpop.permute.xlu1 %1894 }
 0x7c0   : > { %v1906_v51 = vmul.f32 %v1895_v42, %v1810_v0 }
 0x7c1   : > { %v1919_v43 = vpop.permute.xlu0 %1918 }
 0x7c2   : > { %v1930_v49 = vmul.f32 %v1919_v43, %v3348_v12 }
 0x7c3   : > { %v1925_v62 = vpop.permute.xlu2 %1924 }
 0x7c4   : > { %v3390_v58 = vadd.f32 %v1930_v49, %v1906_v51  ;;  %v1933_v1 = vmul.f32 %v1925_v62, %v3361_v31 }
 0x7c9   : > { %v1921_v56 = vpop.permute.xlu1 %1920 }
 0x7ca   : > { %v1931_v54 = vmul.f32 %v1921_v56, %v3350_v27  ;;  %v1908_v27 = vmul.f32 %v1899_v61, %v1812_v37 }
 0x7cc   : > { %v3392_v5 = vadd.f32 %v1931_v54, %v1907_v63 }
 0x7ce   : > { %v1938_v60 = vpack.c.bf16 %v3392_v5, %v3390_v58 }
 0x7d0   : > { %2520 = vmatmul.msk.bf16.vlgmr.msrb.gmra.mxu1 %vm596_vm1, %v1938_v60 }
 0x7d3   : > { %v1923_v36 = vpop.permute.xlu1 %1922 }
 0x7d4   : > { %v1932_v12 = vmul.f32 %v1923_v36, %v3359_v30 }
 0x7d6   : > { %v3401_v3 = vadd.f32 %v1932_v12, %v1908_v27 }
 0x7d9   : > { %v1901_v11 = vpop.permute.xlu0 %1900 }
 0x7da   : > { %v1909_v41 = vmul.f32 %v1901_v11, %v1813_v29 }
 0x7dc   : > { %v3403_v34 = vadd.f32 %v1933_v1, %v1909_v41 }
 0x7de   : > { %v1939_v6 = vpack.c.bf16 %v3403_v34, %v3401_v3 }
 0x7e0   : > { %2521 = vmatmul.msk.bf16.gmra.mxu1 %vm596_vm1, %v1939_v6 }
 0x84d   : > { %v1977_v47 = vpop.f32.mrf.mxu1 }
 0x84e   : > { %v3408_v8 = vadd.f32 %v2660_v9, %v1977_v47 }
 0x850   : > { %v2522_v30 = vmul.f32 -1.442695, %v3408_v8 }
 0x852   : > { %2760 = vpow2.f32 %v2522_v30 }
 0x855   : > { %v1979_v52 = vpop.f32.mrf.mxu1 }
 0x856   : > { %v3411_v10 = vadd.f32 %v2660_v9, %v1979_v52 }
 0x858   : > { %v2761_v31 = vpop.eup %2760  ;;  %v2523_v17 = vmul.f32 -1.442695, %v3411_v10 }
 0x859   : > { %v2003_v21 = vadd.f32 1.0, %v2761_v31 }
 0x85a   : > { %2762 = vpow2.f32 %v2523_v17  ;;  %v2573_v17 = vld [vmem:[%s3479_s6 + $0x8] sm:$0xff] }
 0x85b   : > { %2764 = vrcp.f32 %v2003_v21  ;;  %v2018_v2 = vand.u32 2147483648, %v2003_v21  ;;  %v2016_v7 = vand.u32 2147483647, %v2003_v21  ;;  %vm2012_vm12 = vweird.f32 %v2003_v21  ;;  %2149 = vmatpush.bf16.msrb.mxu2 %v2573_v17 }
 0x85d   : > { %v1982_v55 = vpop.f32.mrf.mxu1  ;;  %v2019_v46 = vor.u32 1.1754944e-38, %v2018_v2  ;;  %vm2017_vm14 = vcmp.eq.f32.partialorder %v2016_v7, 8.507059e+37 }
 0x85e   : > { %v3414_v45 = vadd.f32 %v2660_v9, %v1982_v55 }
 0x860   : > { %v2763_v13 = vpop.eup %2762  ;;  %v2524_v14 = vmul.f32 -1.442695, %v3414_v45 }
 0x861   : > { %v2765_v22 = vpop.eup %2764  ;;  %v2004_v24 = vadd.f32 1.0, %v2763_v13  ;;  %v1987_v13 = vmax.f32 %v3408_v8, 0.0 }
 0x862   : > { %2766 = vpow2.f32 %v2524_v14  ;;  %v2008_v16 = vmul.f32 %v2765_v22, %v2003_v21  ;;  %vm2013_vm11 = vweird.f32 %v2765_v22  ;;  %v2572_v21 = vld [vmem:[%s3479_s6] sm:$0xff] }
 0x863   : > { %2768 = vrcp.f32 %v2004_v24  ;;  %vm2014_vm13 = vmor %vm2012_vm12, %vm2013_vm11  ;;  %v2033_v23 = vand.u32 2147483648, %v2004_v24  ;;  %v2031_v59 = vand.u32 2147483647, %v2004_v24  ;;  %vm2027_vm0 = vweird.f32 %v2004_v24  ;;  %2150 = vmatpush.bf16.msrb.mxu2 %v2572_v21 }
 0x864   : > { %v2009_v18 = vsub.f32 1.0, %v2008_v16  ;;  %v1988_v16 = vmax.f32 %v3411_v10, 0.0  ;;  %vm2194_vm12 = vcmask 7168  }
 0x865   : > { %v1984_v53 = vpop.f32.mrf.mxu1  ;;  %v2034_v48 = vor.u32 1.1754944e-38, %v2033_v23  ;;  %vm2032_vm3 = vcmp.eq.f32.partialorder %v2031_v59, 8.507059e+37  ;;  %v2661_v23 = vld [vmem:[%s3480_s7] ss:$0 sm:$0xff] }
 0x866   : > { %v3417_v32 = vadd.f32 %v2660_v9, %v1984_v53  ;;  %v2010_v19 = vmul.f32 %v2765_v22, %v2009_v18 }
 0x868   : > { %v2767_v44 = vpop.eup %2766  ;;  %v2525_v25 = vmul.f32 -1.442695, %v3417_v32  ;;  %v2011_v4 = vadd.f32 %v2765_v22, %v2010_v19  ;;  %v1990_v8 = vmax.f32 %v3417_v32, 0.0 }
 0x869   : > { %v2769_v26 = vpop.eup %2768  ;;  %v2005_v57 = vadd.f32 1.0, %v2767_v44 }
 0x86a   : > { %2770 = vpow2.f32 %v2525_v25  ;;  %v2015_v20 = vsel %vm2014_vm13, %v2765_v22, %v2011_v4  ;;  %v2023_v28 = vmul.f32 %v2769_v26, %v2004_v24  ;;  %vm2028_vm15 = vweird.f32 %v2769_v26 }
 0x86b   : > { %2772 = vrcp.f32 %v2005_v57  ;;  %v2020_v33 = vsel %vm2017_vm14, %v2019_v46, %v2015_v20  ;;  %vm2029_vm2 = vmor %vm2027_vm0, %vm2028_vm15  ;;  %v2048_v51 = vand.u32 2147483648, %v2005_v57  ;;  %v2046_v60 = vand.u32 2147483647, %v2005_v57 }
 0x86c   : > { %2071 = vrot.lane.b32.xlu0 %v2020_v33, %s2922_s21  ;;  %v2087_v40 = vsub.f32 1.0, %v2020_v33  ;;  %v2024_v35 = vsub.f32 1.0, %v2023_v28  ;;  %vm2042_vm5 = vweird.f32 %v2005_v57  ;;  %v1989_v46 = vmax.f32 %v3414_v45, 0.0 }
 0x86d   : > { %v2049_v62 = vor.u32 1.1754944e-38, %v2048_v51  ;;  %vm2047_vm7 = vcmp.eq.f32.partialorder %v2046_v60, 8.507059e+37 }
 0x86e   : > { %2095 = vrot.lane.b32.xlu2 %v2087_v40, %s2922_s21  ;;  %v2025_v50 = vmul.f32 %v2769_v26, %v2024_v35 }
 0x870   : > { %v2771_v38 = vpop.eup %2770  ;;  %v2026_v39 = vadd.f32 %v2769_v26, %v2025_v50 }
 0x871   : > { %v2773_v42 = vpop.eup %2772  ;;  %v2006_v43 = vadd.f32 1.0, %v2771_v38 }
 0x872   : > { %v2030_v15 = vsel %vm2029_vm2, %v2769_v26, %v2026_v39  ;;  %v2038_v0 = vmul.f32 %v2773_v42, %v2005_v57  ;;  %vm2043_vm4 = vweird.f32 %v2773_v42 }
 0x873   : > { %2774 = vrcp.f32 %v2006_v43  ;;  %v2035_v49 = vsel %vm2032_vm3, %v2034_v48, %v2030_v15  ;;  %vm2044_vm6 = vmor %vm2042_vm5, %vm2043_vm4  ;;  %v2063_v1 = vand.u32 2147483648, %v2006_v43  ;;  %v2061_v6 = vand.u32 2147483647, %v2006_v43 }
 0x874   : > { %2073 = vrot.lane.b32.xlu1 %v2035_v49, %s2922_s21  ;;  %v2088_v56 = vsub.f32 1.0, %v2035_v49  ;;  %v2039_v63 = vsub.f32 1.0, %v2038_v0  ;;  %vm2057_vm9 = vweird.f32 %v2006_v43 }
 0x875   : > { %v2064_v47 = vor.u32 1.1754944e-38, %v2063_v1  ;;  %vm2062_vm11 = vcmp.eq.f32.partialorder %v2061_v6, 8.507059e+37 }
 0x876   : > { %2097 = vrot.lane.b32.xlu0 %v2088_v56, %s2922_s21  ;;  %v2040_v54 = vmul.f32 %v2773_v42, %v2039_v63 }
 0x878   : > { %v2041_v61 = vadd.f32 %v2773_v42, %v2040_v54 }
 0x879   : > { %v2775_v36 = vpop.eup %2774 }
 0x87a   : > { %v2045_v37 = vsel %vm2044_vm6, %v2773_v42, %v2041_v61  ;;  %v2053_v12 = vmul.f32 %v2775_v36, %v2006_v43  ;;  %vm2058_vm8 = vweird.f32 %v2775_v36 }
 0x87b   : > { %v2050_v29 = vsel %vm2047_vm7, %v2049_v62, %v2045_v37  ;;  %vm2059_vm10 = vmor %vm2057_vm9, %vm2058_vm8  ;;  %v2663_v62 = vld [vmem:[#allocation3] ss:$0 sm:$0xff] }
 0x87c   : > { %v2089_v11 = vsub.f32 1.0, %v2050_v29  ;;  %2075 = vrot.lane.b32.xlu1 %v2050_v29, %s2922_s21  ;;  %v2054_v27 = vsub.f32 1.0, %v2053_v12 }
 0x87e   : > { %2099 = vrot.lane.b32.xlu0 %v2089_v11, %s2922_s21  ;;  %v2055_v41 = vmul.f32 %v2775_v36, %v2054_v27 }
 0x880   : > { %v2056_v9 = vadd.f32 %v2775_v36, %v2055_v41 }
 0x882   : > { %v2060_v30 = vsel %vm2059_vm10, %v2775_v36, %v2056_v9 }
 0x883   : > { %v2065_v52 = vsel %vm2062_vm11, %v2064_v47, %v2060_v30 }
 0x884   : > { %v2090_v31 = vsub.f32 1.0, %v2065_v52  ;;  %2077 = vrot.lane.b32.xlu2 %v2065_v52, %s2922_s21 }
 0x886   : > { %2101 = vrot.lane.b32.xlu1 %v2090_v31, %s2922_s21 }
 0x8c8   : > { %v2096_v14 = vpop.permute.xlu2 %2095 }
 0x8c9   : > { %v2107_v53 = vmul.f32 %v2096_v14, %v3390_v58 }
 0x8de   : > { %v2072_v55 = vpop.permute.xlu0 %2071  ;;  %v2078_v57 = vpop.permute.xlu2 %2077 }
 0x8df   : > { %v2083_v24 = vmul.f32 %v2072_v55, %v1987_v13  ;;  %v2086_v28 = vmul.f32 %v2078_v57, %v1990_v8 }
 0x8e1   : > { %v2111_v7 = vadd.f32 %v2107_v53, %v2083_v24 }
 0x8e6   : > { %v2074_v22 = vpop.permute.xlu1 %2073 }
 0x8e7   : > { %v2084_v2 = vmul.f32 %v2074_v22, %v1988_v16 }
 0x8e8   : > { %v2098_v18 = vpop.permute.xlu0 %2097 }
 0x8e9   : > { %v2108_v19 = vmul.f32 %v2098_v18, %v3392_v5 }
 0x8eb   : > { %v2112_v44 = vadd.f32 %v2108_v19, %v2084_v2 }
 0x8ed   : > { %v2115_v25 = vpack.c.bf16 %v2112_v44, %v2111_v7 }
 0x8ee   : > { %v2076_v4 = vpop.permute.xlu1 %2075 }
 0x8ef   : > { %2534 = vmatmul.msk.bf16.vlgmr.msrb.gmra.mxu2 %vm596_vm1, %v2115_v25  ;;  %v2085_v58 = vmul.f32 %v2076_v4, %v1989_v46 }
 0x8f0   : > { %v2100_v26 = vpop.permute.xlu0 %2099 }
 0x8f1   : > { %v2109_v10 = vmul.f32 %v2100_v26, %v3401_v3  ;;  %v2662_v3 = vld [vmem:[%s3481_s8] ss:$0 sm:$0xff] }
 0x8f3   : > { %v2113_v5 = vadd.f32 %v2109_v10, %v2085_v58 }
 0x8f8   : > { %v2102_v20 = vpop.permute.xlu1 %2101 }
 0x8f9   : > { %v2110_v33 = vmul.f32 %v2102_v20, %v3403_v34 }
 0x8fb   : > { %v2114_v40 = vadd.f32 %v2110_v33, %v2086_v28 }
 0x8fd   : > { %v2116_v35 = vpack.c.bf16 %v2114_v40, %v2113_v5 }
 0x8ff   : > { %2535 = vmatmul.msk.bf16.gmra.mxu2 %vm596_vm1, %v2116_v35 }
 0x972   : > { %v2152_v50 = vpop.f32.mrf.mxu2 }
 0x973   : > { %v2153_v32 = vadd.f32 %v2661_v23, %v2152_v50 }
 0x975   : > { %v2162_v45 = vmax.f32 %v2153_v32, 0.0 }
 0x977   : > { %v2170_v59 = vmul.f32 %v2662_v3, %v2162_v45 }
 0x979   : > { %v2174_v38 = vsel %vm596_vm1, %v2170_v59, 0.0 }
 0x97a   : > { %v2154_v34 = vpop.f32.mrf.mxu2  ;;  %2175 = vadd.xlane.f32.xlu2 %v2174_v38 }
 0x97b   : > { %v2155_v39 = vadd.f32 %v2661_v23, %v2154_v34 }
 0x97d   : > { %v2163_v42 = vmax.f32 %v2155_v39, 0.0 }
 0x97f   : > { %v2171_v43 = vmul.f32 %v2662_v3, %v2163_v42 }
 0x981   : > { %v2177_v48 = vsel %vm596_vm1, %v2171_v43, 0.0 }
 0x982   : > { %v2157_v15 = vpop.f32.mrf.mxu2  ;;  %2178 = vadd.xlane.f32.xlu0 %v2177_v48 }
 0x983   : > { %v2158_v0 = vadd.f32 %v2661_v23, %v2157_v15 }
 0x985   : > { %v2164_v49 = vmax.f32 %v2158_v0, 0.0 }
 0x987   : > { %v2172_v56 = vmul.f32 %v2662_v3, %v2164_v49 }
 0x989   : > { %v2180_v63 = vsel %vm596_vm1, %v2172_v56, 0.0 }
 0x98a   : > { %v2159_v51 = vpop.f32.mrf.mxu2  ;;  %2181 = vadd.xlane.f32.xlu1 %v2180_v63 }
 0x98b   : > { %v2160_v54 = vadd.f32 %v2661_v23, %v2159_v51 }
 0x98d   : > { %v2165_v60 = vmax.f32 %v2160_v54, 0.0 }
 0x98f   : > { %v2173_v61 = vmul.f32 %v2662_v3, %v2165_v60 }
 0x991   : > { %v2183_v36 = vsel %vm596_vm1, %v2173_v61, 0.0 }
 0x992   : > { %2184 = vadd.xlane.f32.xlu2 %v2183_v36 }
 0x9ed   : > { %v2176_v37 = vpop.xlane.xlu2 %2175 }
 0x9ee   : > { %v2190_v12 = vadd.f32 %v2663_v62, %v2176_v37 }
 0x9f0   : > { %2195 = vst.msk [vmem:[%s3068_s25] sm:$0xff] %vm2194_vm12, %v2190_v12 }
 0x9f5   : > { %v2179_v29 = vpop.xlane.xlu0 %2178 }
 0x9f6   : > { %v2191_v11 = vadd.f32 %v2663_v62, %v2179_v29 }
 0x9f8   : > { %2196 = vst.msk [vmem:[%s3068_s25 + $0x8] sm:$0xff] %vm2194_vm12, %v2191_v11 }
 0x9fd   : > { %v2182_v27 = vpop.xlane.xlu1 %2181 }
 0x9fe   : > { %v2192_v1 = vadd.f32 %v2663_v62, %v2182_v27 }
 0xa00   : > { %2197 = vst.msk [vmem:[%s3068_s25 + $0x10] sm:$0xff] %vm2194_vm12, %v2192_v1 }
 0xa05   : > { %v2185_v41 = vpop.xlane.xlu2 %2184 }
 0xa06   : > { %v2193_v6 = vadd.f32 %v2663_v62, %v2185_v41 }
 0xa08   : > { %2198 = vst.msk [vmem:[%s3068_s25 + $0x18] sm:$0xff] %vm2194_vm12, %v2193_v6 }
 0xa09 PF: > { %s24_s19 = sadd.s32 1, %s2912_s19   ;;  %s3489_s15 = smov %s2904_s17 }
 0xa0a   : > { %p21_p11 = scmp.ge.s32.totalorder %s24_s19, 6   ;;  %s3490_s16 = smov %s2908_s18 }
 0xa0b   : > { %s3491_s17 = smov %s3494_s30  ;;  %s3492_s18 = smov %s3498_s11 }
 0xa0c   :  { %23 = sbr.rel (!%p21_p11) target bundleno = 7 (0x7), region = 127 }
 0xa11   :  { %2229 = vsyncpa [#allocation5], 1 }
 0xa12   :  { %2231 = vsyncpa [#allocation5 + $0x1], 1 }
 0xa13   :  { %2232 = vsyncpa [#allocation7], 1 }

</bundles_post_ra>
